<compile_context>
chip_gen: v7x
topology: tpu7x:2x2x1
jax: 0.10.0
libtpu: 0.0.40
codegen_flags: <defaults>
</compile_context>

<pallas_src>
import functools

import jax
import jax.numpy as jnp
from jax.experimental import pallas as pl
from jax.experimental.pallas import tpu as pltpu

# ------------------------- sizes (small, synthetic) -------------------------
B = 2            # batch
S_SENT = 8       # sentence seq len
S_SUM = 8        # summarization seq len
S_LAB = 8        # label / decoder seq len
D = 128          # hidden size (lane-dense stand-in for 768)
V = 128          # vocab size (lane-dense stand-in for ~50k)
IMG_C, IMG_H, IMG_W = 3, 16, 16
PATCH = 8
N_PATCH = (IMG_H // PATCH) * (IMG_W // PATCH)        # 4 patches
PATCH_DIM = IMG_C * PATCH * PATCH                    # 192
PAD_ID = 1
DEC_START_ID = 2

_VMEM = pl.BlockSpec(memory_space=pltpu.MemorySpace.VMEM)
_SMEM = pl.BlockSpec(memory_space=pltpu.MemorySpace.SMEM)


# ------------------------------ kernel helpers ------------------------------
def _gelu(x):
    # TODO(synk): tanh-approx GELU; reference nn.GELU uses erf (~1e-3 close).
    c = jnp.float32(0.7978845608028654)  # sqrt(2/pi)
    return 0.5 * x * (1.0 + jnp.tanh(c * (x + 0.044715 * x * x * x)))


def _mm(a_f32, w_bf16):
    # activation (f32) x pre-cast bf16 weight -> f32 accumulate on the MXU.
    return jnp.dot(a_f32.astype(jnp.bfloat16), w_bf16,
                   preferred_element_type=jnp.float32)


# ------------------------------ fused kernel --------------------------------
def fused_mmss_kernel(
    # data
    enc_ids_ref, dec_ids_ref, labels_ref, eps_ref, patch_ref, loss_w_ref,
    # shared embedding table + positions
    tok_emb_ref, pos_emb_ref,
    # text encoder stand-in
    enc_w1_ref, enc_b1_ref, enc_w2_ref, enc_b2_ref,
    # vision tower stand-in + fused mean/log_var heads
    patch_w_ref, patch_b_ref, vit_posm_ref, pool_w_ref, pool_b_ref,
    vis_w1_ref, vis_b1_ref, vis_w2_ref, vis_b2_ref,
    # discriminator
    disc_wi_ref, disc_wt_ref, disc_b_ref,
    # decoder stand-in + tied lm_head bias
    ctx_w_ref, ctx_b_ref,
    dec_w1_ref, dec_b1_ref, dec_w2_ref, dec_b2_ref, lm_bias_ref,
    # output: [total, masked_lm, kld, positive, negative] in SMEM
    loss_ref,
    *, batch, s_enc, s_lab, n_patch, d, vocab):

  f32 = jnp.float32
  tok_emb = tok_emb_ref[...]                              # bf16 (V, D)
  pos_emb = pos_emb_ref[...]                              # f32  (S, D)

  # ---------------- 1. text encoder: sentence + summarization stacked ------
  n_seq = 2 * batch
  rows_e = n_seq * s_enc
  cls_e = jax.lax.broadcasted_iota(jnp.int32, (rows_e, vocab), 1)
  # TODO(synk): one-hot gather is fine at V=128; switch to a scalar-prefetched
  # DMA gather before V grows to real vocab sizes.
  onehot_e = (cls_e == enc_ids_ref[...]).astype(jnp.bfloat16)
  x = jnp.dot(onehot_e, tok_emb, preferred_element_type=f32)      # (rows_e, D)
  # positional embedding: sublane broadcast add (seq_len == 8 == sublane tile)
  x = (x.reshape(n_seq, s_enc, d) + pos_emb[None]).reshape(rows_e, d)
  # TODO(synk): embedding + MLP stands in for the pretrained BART encoder;
  # self-attention / attention_mask are not modeled.
  h = _gelu(_mm(x, enc_w1_ref[...]) + enc_b1_ref[...])
  h = _mm(h, enc_w2_ref[...]) + enc_b2_ref[...]                   # (rows_e, D)
  h3 = h.reshape(n_seq, s_enc, d)
  min_pool = jnp.min(h3, axis=1)                  # (2B, D)  .min(dim=1).values
  sum_pool = jnp.sum(h3, axis=1)                  # (2B, D)
  lang_sum = sum_pool[:batch]                     # sentence-batch seq sums

  # ---------------- 2. vision tower + VAE heads + KL + reparameterize ------
  emb = jnp.dot(patch_ref[...], patch_w_ref[...],
                preferred_element_type=f32) + patch_b_ref[...]    # (B*NP, D)
  pooled = jnp.mean(emb.reshape(batch, n_patch, d), axis=1)       # (B, D)
  # adding per-patch positional embeddings then mean-pooling == adding their
  # mean once (precomputed at init).
  pooled = pooled + vit_posm_ref[...]
  # TODO(synk): mean-pool + tanh pooler stands in for the pretrained ViT
  # (transformer blocks + CLS pooler).
  pooled = jnp.tanh(_mm(pooled, pool_w_ref[...]) + pool_b_ref[...])
  # vision_mean & vision_log_var fused: layer-1 weights concatenated along N,
  # layer-2 block-diagonal -> one lane-dense (B, 2D) pass.
  hv = _gelu(_mm(pooled, vis_w1_ref[...]) + vis_b1_ref[...])      # (B, 2D)
  out = _mm(hv, vis_w2_ref[...]) + vis_b2_ref[...]                # (B, 2D)
  means = out[:, :d]
  log_vars = out[:, d:]
  std = jnp.exp(0.5 * log_vars)                                   # one exp/elem
  # KL(N(mean, exp(.5 lv)) || N(0, exp(.5)))  with constants folded:
  #   log(s2/s1) + (s1^2 + m^2)/(2 s2^2) - 1/2  ==  (exp(lv)+m^2)/(2e) - lv/2
  inv_2e = f32(0.18393972058572117)
  kl = (std * std + means * means) * inv_2e - 0.5 * log_vars
  kld = jnp.sum(kl) / f32(batch)                                  # .mean(0).sum()
  image_embeds = means + eps_ref[...] * std                       # reparameterize

  # ---------------- 3. discriminator: positive + negative BCE --------------
  # disc(concat(img, txt)) == img @ w[:D] + txt @ w[D:] + b.  Image half is
  # shared; both text halves go through a single (2B, D) @ (D, 1) matmul.
  z_img = _mm(image_embeds, disc_wi_ref[...]) + disc_b_ref[...]   # (B, 1)
  z_txt = _mm(min_pool, disc_wt_ref[...])                         # (2B, 1)
  z_pos = z_img + z_txt[batch:]     # summarization embeds, target = 1
  z_neg = z_img + z_txt[:batch]     # language (negative) embeds, target = 0
  n_d = f32(batch)
  sp_pos = jnp.log(1.0 + jnp.exp(-jnp.abs(z_pos)))
  sp_neg = jnp.log(1.0 + jnp.exp(-jnp.abs(z_neg)))
  positive_loss = jnp.sum(jnp.maximum(z_pos, 0.0) - z_pos + sp_pos) / n_d
  negative_loss = jnp.sum(jnp.maximum(z_neg, 0.0) + sp_neg) / n_d

  # ---------------- 4. decoder + tied lm_head + cross-entropy --------------
  rows_d = batch * s_lab
  cls_d = jax.lax.broadcasted_iota(jnp.int32, (rows_d, vocab), 1)
  onehot_d = (cls_d == dec_ids_ref[...]).astype(jnp.bfloat16)
  xd = jnp.dot(onehot_d, tok_emb, preferred_element_type=f32)     # (rows_d, D)
  xd = (xd.reshape(batch, s_lab, d) + pos_emb[None]).reshape(rows_d, d)
  # encoder context = mean over (lang hidden states ++ image embed)
  ctx_in = (lang_sum + image_embeds) * f32(1.0 / (s_enc + 1))
  ctx = _mm(ctx_in, ctx_w_ref[...]) + ctx_b_ref[...]              # (B, D)
  # TODO(synk): embedding + MLP stands in for the pretrained BART decoder
  # (no self/cross-attention); the context enters via the pooled projection.
  hd = _gelu(_mm(xd, dec_w1_ref[...]) + dec_b1_ref[...])          # (rows_d, D)
  hd = (hd.reshape(batch, s_lab, d) + ctx[:, None, :]).reshape(rows_d, d)
  hd = _mm(hd, dec_w2_ref[...]) + dec_b2_ref[...]                 # (rows_d, D)
  # tied lm_head: contract on D against the bf16 embedding table (no
  # materialized transpose) + final_logits_bias.
  logits = jax.lax.dot_general(
      hd.astype(jnp.bfloat16), tok_emb,
      (((1,), (1,)), ((), ())),
      preferred_element_type=f32) + lm_bias_ref[...]              # (rows_d, V)
  labels = labels_ref[...]                                        # (rows_d, 1)
  m = jnp.max(logits, axis=-1, keepdims=True)
  lse = m + jnp.log(jnp.sum(jnp.exp(logits - m), axis=-1, keepdims=True))
  picked = jnp.sum(logits * (cls_d == labels).astype(f32),
                   axis=-1, keepdims=True)
  valid = (labels != -100).astype(f32)                            # ignore_index
  n_valid = jnp.maximum(jnp.sum(valid), 1.0)
  masked_lm_loss = jnp.sum((lse - picked) * valid) / n_valid

  # ---------------- 5. total loss (weights arrive via SMEM) ----------------
  total = (masked_lm_loss
           + loss_w_ref[0] * kld
           + loss_w_ref[1] * positive_loss
           + loss_w_ref[2] * negative_loss)
  loss_ref[0] = total
  loss_ref[1] = masked_lm_loss
  loss_ref[2] = kld
  loss_ref[3] = positive_loss
  loss_ref[4] = negative_loss


# ------------------------------- plain JAX glue ------------------------------
def shift_tokens_right(input_ids, pad_token_id, decoder_start_token_id):
  shifted = jnp.zeros_like(input_ids)
  shifted = shifted.at[:, 1:].set(input_ids[:, :-1])
  shifted = shifted.at[:, 0].set(decoder_start_token_id)
  return jnp.where(shifted == -100, pad_token_id, shifted)


def patchify(pixel_values):
  # NCHW -> (B * num_patches, C*ph*pw); the stride==kernel patch conv then
  # becomes a plain matmul inside the kernel.
  b = pixel_values.shape[0]
  x = pixel_values.reshape(b, IMG_C, IMG_H // PATCH, PATCH, IMG_W // PATCH, PATCH)
  x = x.transpose(0, 2, 4, 1, 3, 5)
  return x.reshape(b * N_PATCH, PATCH_DIM)


def init_params(key):
  def dense(k, k_in, k_out, scale=0.05):
    kw, kb = jax.random.split(k)
    return (scale * jax.random.normal(kw, (k_in, k_out), jnp.float32),
            scale * jax.random.normal(kb, (k_out,), jnp.float32))

  keys = jax.random.split(key, 16)
  p = {}
  # matmul weights stored in bf16 (halves DMA bytes, no in-kernel casts);
  # biases / positions stay f32 (added to f32 accumulators).
  p["tok_emb"] = (0.05 * jax.random.normal(keys[0], (V, D), jnp.float32)
                  ).astype(jnp.bfloat16)
  p["pos_emb"] = 0.05 * jax.random.normal(
      keys[1], (max(S_SENT, S_SUM, S_LAB), D), jnp.float32)
  def bf(w):
    return w.astype(jnp.bfloat16)
  w, b = dense(keys[2], D, D); p["enc_w1"], p["enc_b1"] = bf(w), b.reshape(1, D)
  w, b = dense(keys[3], D, D); p["enc_w2"], p["enc_b2"] = bf(w), b.reshape(1, D)
  w, b = dense(keys[4], PATCH_DIM, D)
  p["patch_w"], p["patch_b"] = bf(w), b.reshape(1, D)
  vit_pos = 0.05 * jax.random.normal(keys[5], (N_PATCH, D), jnp.float32)
  p["vit_pos_mean"] = jnp.mean(vit_pos, axis=0, keepdims=True)     # (1, D)
  w, b = dense(keys[6], D, D); p["pool_w"], p["pool_b"] = bf(w), b.reshape(1, D)
  vm_w1, vm_b1 = dense(keys[7], D, D)            # vision_mean head
  vm_w2, vm_b2 = dense(keys[8], D, D)
  vlv_w1, vlv_b1 = dense(keys[9], D, D)          # vision_log_var head
  vlv_w2, vlv_b2 = dense(keys[10], D, D)
  # fuse the two heads once at init: layer-1 along N, layer-2 block-diagonal
  p["vis_w1"] = bf(jnp.concatenate([vm_w1, vlv_w1], axis=1))       # (D, 2D)
  p["vis_b1"] = jnp.concatenate([vm_b1, vlv_b1], axis=0).reshape(1, 2 * D)
  w2 = jnp.zeros((2 * D, 2 * D), jnp.float32)
  w2 = w2.at[:D, :D].set(vm_w2).at[D:, D:].set(vlv_w2)
  p["vis_w2"] = bf(w2)                                             # (2D, 2D)
  p["vis_b2"] = jnp.concatenate([vm_b2, vlv_b2], axis=0).reshape(1, 2 * D)
  disc_w, disc_b = dense(keys[11], 2 * D, 1)
  p["disc_w_img"] = bf(disc_w[:D])                                 # (D, 1)
  p["disc_w_txt"] = bf(disc_w[D:])                                 # (D, 1)
  p["disc_b"] = disc_b.reshape(1, 1)
  w, b = dense(keys[12], D, D); p["dec_w1"], p["dec_b1"] = bf(w), b.reshape(1, D)
  w, b = dense(keys[13], D, D); p["dec_w2"], p["dec_b2"] = bf(w), b.reshape(1, D)
  w, b = dense(keys[14], D, D); p["ctx_w"], p["ctx_b"] = bf(w), b.reshape(1, D)
  p["final_logits_bias"] = jnp.zeros((1, V), jnp.float32)          # tied lm_head
  return p


def forward(p, loss_weights, pixel_values, sent_ids, sent_mask, summ_ids,
            summ_mask, labels, eps):
  # TODO(synk): attention masks accepted but not modeled by the stand-in
  # encoder (the reference min-pooling also includes padded positions).
  del sent_mask, summ_mask
  batch, s = sent_ids.shape
  dec_ids = shift_tokens_right(labels, PAD_ID, DEC_START_ID)
  enc_ids = jnp.concatenate([sent_ids, summ_ids], axis=0)          # (2B, S)
  patches = patchify(pixel_values).astype(jnp.bfloat16)

  kern = functools.partial(
      fused_mmss_kernel, batch=batch, s_enc=s, s_lab=labels.shape[1],
      n_patch=N_PATCH, d=D, vocab=V)

  losses = pl.pallas_call(
      kern,
      out_shape=jax.ShapeDtypeStruct((5,), jnp.float32),
      in_specs=[_VMEM] * 5 + [_SMEM] + [_VMEM] * 25,
      out_specs=_SMEM,
  )(enc_ids.reshape(-1, 1).astype(jnp.int32),
    dec_ids.reshape(-1, 1).astype(jnp.int32),
    labels.reshape(-1, 1).astype(jnp.int32),
    eps, patches, loss_weights,
    p["tok_emb"], p["pos_emb"],
    p["enc_w1"], p["enc_b1"], p["enc_w2"], p["enc_b2"],
    p["patch_w"], p["patch_b"], p["vit_pos_mean"], p["pool_w"], p["pool_b"],
    p["vis_w1"], p["vis_b1"], p["vis_w2"], p["vis_b2"],
    p["disc_w_img"], p["disc_w_txt"], p["disc_b"],
    p["ctx_w"], p["ctx_b"],
    p["dec_w1"], p["dec_b1"], p["dec_w2"], p["dec_b2"],
    p["final_logits_bias"])

  return losses[0], losses[1], losses[2], losses[3], losses[4]


if __name__ == "__main__":
  key = jax.random.PRNGKey(0)
  kp, k1, k2, k3, k4, k5 = jax.random.split(key, 6)

  params = init_params(kp)
  loss_weights = jnp.array([0.1, 0.5, 0.5], jnp.float32)  # kld, pos, neg

  pixel_values = jax.random.normal(k1, (B, IMG_C, IMG_H, IMG_W), jnp.float32)
  sentence_input_ids = jax.random.randint(k2, (B, S_SENT), 0, V, jnp.int32)
  sentence_attention_mask = jnp.ones((B, S_SENT), jnp.int32)
  summarization_input_ids = jax.random.randint(k3, (B, S_SUM), 0, V, jnp.int32)
  summarization_attention_mask = jnp.ones((B, S_SUM), jnp.int32)
  labels = jax.random.randint(k4, (B, S_LAB), 0, V, jnp.int32)
  eps = jax.random.normal(k5, (B, D), jnp.float32)   # reparameterization noise

  fwd = jax.jit(forward)
  outs = fwd(params, loss_weights, pixel_values, sentence_input_ids,
             sentence_attention_mask, summarization_input_ids,
             summarization_attention_mask, labels, eps)
  outs = jax.block_until_ready(outs)
  print("KERNEL_OK")
</pallas_src>

<mosaic_0001>
module attributes {stable_mosaic.version = 11 : i64} {
  func.func @fused_mmss_kernel(%arg0: memref<32x1xi32, #tpu.memory_space<vmem>>, %arg1: memref<16x1xi32, #tpu.memory_space<vmem>>, %arg2: memref<16x1xi32, #tpu.memory_space<vmem>>, %arg3: memref<2x128xf32, #tpu.memory_space<vmem>>, %arg4: memref<8x192xbf16, #tpu.memory_space<vmem>>, %arg5: memref<3xf32, #tpu.memory_space<smem>>, %arg6: memref<128x128xbf16, #tpu.memory_space<vmem>>, %arg7: memref<8x128xf32, #tpu.memory_space<vmem>>, %arg8: memref<128x128xbf16, #tpu.memory_space<vmem>>, %arg9: memref<1x128xf32, #tpu.memory_space<vmem>>, %arg10: memref<128x128xbf16, #tpu.memory_space<vmem>>, %arg11: memref<1x128xf32, #tpu.memory_space<vmem>>, %arg12: memref<192x128xbf16, #tpu.memory_space<vmem>>, %arg13: memref<1x128xf32, #tpu.memory_space<vmem>>, %arg14: memref<1x128xf32, #tpu.memory_space<vmem>>, %arg15: memref<128x128xbf16, #tpu.memory_space<vmem>>, %arg16: memref<1x128xf32, #tpu.memory_space<vmem>>, %arg17: memref<128x256xbf16, #tpu.memory_space<vmem>>, %arg18: memref<1x256xf32, #tpu.memory_space<vmem>>, %arg19: memref<256x256xbf16, #tpu.memory_space<vmem>>, %arg20: memref<1x256xf32, #tpu.memory_space<vmem>>, %arg21: memref<128x1xbf16, #tpu.memory_space<vmem>>, %arg22: memref<128x1xbf16, #tpu.memory_space<vmem>>, %arg23: memref<1x1xf32, #tpu.memory_space<vmem>>, %arg24: memref<128x128xbf16, #tpu.memory_space<vmem>>, %arg25: memref<1x128xf32, #tpu.memory_space<vmem>>, %arg26: memref<128x128xbf16, #tpu.memory_space<vmem>>, %arg27: memref<1x128xf32, #tpu.memory_space<vmem>>, %arg28: memref<128x128xbf16, #tpu.memory_space<vmem>>, %arg29: memref<1x128xf32, #tpu.memory_space<vmem>>, %arg30: memref<1x128xf32, #tpu.memory_space<vmem>>, %arg31: memref<5xf32, #tpu.memory_space<smem>>) attributes {dimension_semantics = [], scalar_prefetch = 0 : i64, scratch_operands = 0 : i64, tpu.core_type = #tpu.core_type<tc>} {
    %c0 = arith.constant 0 : index
    %c0_0 = arith.constant 0 : index
    %0 = vector.load %arg6[%c0, %c0_0] : memref<128x128xbf16, #tpu.memory_space<vmem>>, vector<128x128xbf16>
    %c0_1 = arith.constant 0 : index
    %c0_2 = arith.constant 0 : index
    %1 = vector.load %arg7[%c0_1, %c0_2] : memref<8x128xf32, #tpu.memory_space<vmem>>, vector<8x128xf32>
    %2 = tpu.iota {dimensions = array<i32: 1>} : vector<32x128xi32>
    %c0_3 = arith.constant 0 : index
    %c0_4 = arith.constant 0 : index
    %3 = vector.load %arg0[%c0_3, %c0_4] : memref<32x1xi32, #tpu.memory_space<vmem>>, vector<32x1xi32>
    %4 = vector.broadcast %3 : vector<32x1xi32> to vector<32x128xi32>
    %5 = arith.cmpi eq, %2, %4 : vector<32x128xi32>
    %6 = arith.extui %5 : vector<32x128xi1> to vector<32x128xi32>
    %7 = arith.sitofp %6 : vector<32x128xi32> to vector<32x128xf32>
    %8 = arith.truncf %7 : vector<32x128xf32> to vector<32x128xbf16>
    %cst = arith.constant dense<0.000000e+00> : vector<32x128xf32>
    %9 = tpu.matmul %8, %0, %cst {dimension_numbers = #tpu.dot_dimension_numbers<[1], [0], [0], [1], [0, 0, 1, 1], [], []>} : vector<32x128xbf16>, vector<128x128xbf16>, vector<32x128xf32> -> vector<32x128xf32>
    %10 = vector.shape_cast %9 : vector<32x128xf32> to vector<4x8x128xf32>
    %11 = vector.shape_cast %1 : vector<8x128xf32> to vector<1x8x128xf32>
    %12 = vector.broadcast %11 : vector<1x8x128xf32> to vector<4x8x128xf32>
    %13 = arith.addf %10, %12 : vector<4x8x128xf32>
    %14 = vector.shape_cast %13 : vector<4x8x128xf32> to vector<32x128xf32>
    %c0_5 = arith.constant 0 : index
    %c0_6 = arith.constant 0 : index
    %15 = vector.load %arg8[%c0_5, %c0_6] : memref<128x128xbf16, #tpu.memory_space<vmem>>, vector<128x128xbf16>
    %16 = arith.truncf %14 : vector<32x128xf32> to vector<32x128xbf16>
    %cst_7 = arith.constant dense<0.000000e+00> : vector<32x128xf32>
    %17 = tpu.matmul %16, %15, %cst_7 {dimension_numbers = #tpu.dot_dimension_numbers<[1], [0], [0], [1], [0, 0, 1, 1], [], []>} : vector<32x128xbf16>, vector<128x128xbf16>, vector<32x128xf32> -> vector<32x128xf32>
    %c0_8 = arith.constant 0 : index
    %c0_9 = arith.constant 0 : index
    %18 = vector.load %arg9[%c0_8, %c0_9] : memref<1x128xf32, #tpu.memory_space<vmem>>, vector<1x128xf32>
    %19 = vector.broadcast %18 : vector<1x128xf32> to vector<32x128xf32>
    %20 = arith.addf %17, %19 : vector<32x128xf32>
    %cst_10 = arith.constant 5.000000e-01 : f32
    %21 = vector.broadcast %cst_10 : f32 to vector<32x128xf32>
    %22 = arith.mulf %21, %20 : vector<32x128xf32>
    %cst_11 = arith.constant 4.471500e-02 : f32
    %23 = vector.broadcast %cst_11 : f32 to vector<32x128xf32>
    %24 = arith.mulf %23, %20 : vector<32x128xf32>
    %25 = arith.mulf %24, %20 : vector<32x128xf32>
    %26 = arith.mulf %25, %20 : vector<32x128xf32>
    %27 = arith.addf %20, %26 : vector<32x128xf32>
    %cst_12 = arith.constant 0.797884583 : f32
    %28 = vector.broadcast %cst_12 : f32 to vector<32x128xf32>
    %29 = arith.mulf %28, %27 : vector<32x128xf32>
    %30 = math.tanh %29 : vector<32x128xf32>
    %cst_13 = arith.constant 1.000000e+00 : f32
    %31 = vector.broadcast %cst_13 : f32 to vector<32x128xf32>
    %32 = arith.addf %31, %30 : vector<32x128xf32>
    %33 = arith.mulf %22, %32 : vector<32x128xf32>
    %c0_14 = arith.constant 0 : index
    %c0_15 = arith.constant 0 : index
    %34 = vector.load %arg10[%c0_14, %c0_15] : memref<128x128xbf16, #tpu.memory_space<vmem>>, vector<128x128xbf16>
    %35 = arith.truncf %33 : vector<32x128xf32> to vector<32x128xbf16>
    %cst_16 = arith.constant dense<0.000000e+00> : vector<32x128xf32>
    %36 = tpu.matmul %35, %34, %cst_16 {dimension_numbers = #tpu.dot_dimension_numbers<[1], [0], [0], [1], [0, 0, 1, 1], [], []>} : vector<32x128xbf16>, vector<128x128xbf16>, vector<32x128xf32> -> vector<32x128xf32>
    %c0_17 = arith.constant 0 : index
    %c0_18 = arith.constant 0 : index
    %37 = vector.load %arg11[%c0_17, %c0_18] : memref<1x128xf32, #tpu.memory_space<vmem>>, vector<1x128xf32>
    %38 = vector.broadcast %37 : vector<1x128xf32> to vector<32x128xf32>
    %39 = arith.addf %36, %38 : vector<32x128xf32>
    %40 = vector.shape_cast %39 : vector<32x128xf32> to vector<4x8x128xf32>
    %cst_19 = arith.constant dense<0x7F800000> : vector<4x128xf32>
    %41 = vector.multi_reduction <minimumf>, %40, %cst_19 [1] : vector<4x8x128xf32> to vector<4x128xf32>
    %cst_20 = arith.constant dense<0.000000e+00> : vector<4x128xf32>
    %42 = vector.multi_reduction <add>, %40, %cst_20 [1] : vector<4x8x128xf32> to vector<4x128xf32>
    %43 = vector.extract_strided_slice %42 {offsets = [0, 0], sizes = [2, 128], strides = [1, 1]} : vector<4x128xf32> to vector<2x128xf32>
    %c0_21 = arith.constant 0 : index
    %c0_22 = arith.constant 0 : index
    %44 = vector.load %arg4[%c0_21, %c0_22] : memref<8x192xbf16, #tpu.memory_space<vmem>>, vector<8x192xbf16>
    %c0_23 = arith.constant 0 : index
    %c0_24 = arith.constant 0 : index
    %45 = vector.load %arg12[%c0_23, %c0_24] : memref<192x128xbf16, #tpu.memory_space<vmem>>, vector<192x128xbf16>
    %cst_25 = arith.constant dense<0.000000e+00> : vector<8x128xf32>
    %46 = tpu.matmul %44, %45, %cst_25 {dimension_numbers = #tpu.dot_dimension_numbers<[1], [0], [0], [1], [0, 0, 1, 1], [], []>} : vector<8x192xbf16>, vector<192x128xbf16>, vector<8x128xf32> -> vector<8x128xf32>
    %c0_26 = arith.constant 0 : index
    %c0_27 = arith.constant 0 : index
    %47 = vector.load %arg13[%c0_26, %c0_27] : memref<1x128xf32, #tpu.memory_space<vmem>>, vector<1x128xf32>
    %48 = vector.broadcast %47 : vector<1x128xf32> to vector<8x128xf32>
    %49 = arith.addf %46, %48 : vector<8x128xf32>
    %50 = vector.shape_cast %49 : vector<8x128xf32> to vector<2x4x128xf32>
    %cst_28 = arith.constant dense<0.000000e+00> : vector<2x128xf32>
    %51 = vector.multi_reduction <add>, %50, %cst_28 [1] : vector<2x4x128xf32> to vector<2x128xf32>
    %cst_29 = arith.constant 4.000000e+00 : f32
    %52 = vector.broadcast %cst_29 : f32 to vector<2x128xf32>
    %53 = arith.divf %51, %52 : vector<2x128xf32>
    %c0_30 = arith.constant 0 : index
    %c0_31 = arith.constant 0 : index
    %54 = vector.load %arg14[%c0_30, %c0_31] : memref<1x128xf32, #tpu.memory_space<vmem>>, vector<1x128xf32>
    %55 = vector.broadcast %54 : vector<1x128xf32> to vector<2x128xf32>
    %56 = arith.addf %53, %55 : vector<2x128xf32>
    %c0_32 = arith.constant 0 : index
    %c0_33 = arith.constant 0 : index
    %57 = vector.load %arg15[%c0_32, %c0_33] : memref<128x128xbf16, #tpu.memory_space<vmem>>, vector<128x128xbf16>
    %58 = arith.truncf %56 : vector<2x128xf32> to vector<2x128xbf16>
    %cst_34 = arith.constant dense<0.000000e+00> : vector<2x128xf32>
    %59 = tpu.matmul %58, %57, %cst_34 {dimension_numbers = #tpu.dot_dimension_numbers<[1], [0], [0], [1], [0, 0, 1, 1], [], []>} : vector<2x128xbf16>, vector<128x128xbf16>, vector<2x128xf32> -> vector<2x128xf32>
    %c0_35 = arith.constant 0 : index
    %c0_36 = arith.constant 0 : index
    %60 = vector.load %arg16[%c0_35, %c0_36] : memref<1x128xf32, #tpu.memory_space<vmem>>, vector<1x128xf32>
    %61 = vector.broadcast %60 : vector<1x128xf32> to vector<2x128xf32>
    %62 = arith.addf %59, %61 : vector<2x128xf32>
    %63 = math.tanh %62 : vector<2x128xf32>
    %c0_37 = arith.constant 0 : index
    %c0_38 = arith.constant 0 : index
    %64 = vector.load %arg17[%c0_37, %c0_38] : memref<128x256xbf16, #tpu.memory_space<vmem>>, vector<128x256xbf16>
    %65 = arith.truncf %63 : vector<2x128xf32> to vector<2x128xbf16>
    %cst_39 = arith.constant dense<0.000000e+00> : vector<2x256xf32>
    %66 = tpu.matmul %65, %64, %cst_39 {dimension_numbers = #tpu.dot_dimension_numbers<[1], [0], [0], [1], [0, 0, 1, 1], [], []>} : vector<2x128xbf16>, vector<128x256xbf16>, vector<2x256xf32> -> vector<2x256xf32>
    %c0_40 = arith.constant 0 : index
    %c0_41 = arith.constant 0 : index
    %67 = vector.load %arg18[%c0_40, %c0_41] : memref<1x256xf32, #tpu.memory_space<vmem>>, vector<1x256xf32>
    %68 = vector.broadcast %67 : vector<1x256xf32> to vector<2x256xf32>
    %69 = arith.addf %66, %68 : vector<2x256xf32>
    %cst_42 = arith.constant 5.000000e-01 : f32
    %70 = vector.broadcast %cst_42 : f32 to vector<2x256xf32>
    %71 = arith.mulf %70, %69 : vector<2x256xf32>
    %cst_43 = arith.constant 4.471500e-02 : f32
    %72 = vector.broadcast %cst_43 : f32 to vector<2x256xf32>
    %73 = arith.mulf %72, %69 : vector<2x256xf32>
    %74 = arith.mulf %73, %69 : vector<2x256xf32>
    %75 = arith.mulf %74, %69 : vector<2x256xf32>
    %76 = arith.addf %69, %75 : vector<2x256xf32>
    %cst_44 = arith.constant 0.797884583 : f32
    %77 = vector.broadcast %cst_44 : f32 to vector<2x256xf32>
    %78 = arith.mulf %77, %76 : vector<2x256xf32>
    %79 = math.tanh %78 : vector<2x256xf32>
    %cst_45 = arith.constant 1.000000e+00 : f32
    %80 = vector.broadcast %cst_45 : f32 to vector<2x256xf32>
    %81 = arith.addf %80, %79 : vector<2x256xf32>
    %82 = arith.mulf %71, %81 : vector<2x256xf32>
    %c0_46 = arith.constant 0 : index
    %c0_47 = arith.constant 0 : index
    %83 = vector.load %arg19[%c0_46, %c0_47] : memref<256x256xbf16, #tpu.memory_space<vmem>>, vector<256x256xbf16>
    %84 = arith.truncf %82 : vector<2x256xf32> to vector<2x256xbf16>
    %cst_48 = arith.constant dense<0.000000e+00> : vector<2x256xf32>
    %85 = tpu.matmul %84, %83, %cst_48 {dimension_numbers = #tpu.dot_dimension_numbers<[1], [0], [0], [1], [0, 0, 1, 1], [], []>} : vector<2x256xbf16>, vector<256x256xbf16>, vector<2x256xf32> -> vector<2x256xf32>
    %c0_49 = arith.constant 0 : index
    %c0_50 = arith.constant 0 : index
    %86 = vector.load %arg20[%c0_49, %c0_50] : memref<1x256xf32, #tpu.memory_space<vmem>>, vector<1x256xf32>
    %87 = vector.broadcast %86 : vector<1x256xf32> to vector<2x256xf32>
    %88 = arith.addf %85, %87 : vector<2x256xf32>
    %89 = vector.extract_strided_slice %88 {offsets = [0, 0], sizes = [2, 128], strides = [1, 1]} : vector<2x256xf32> to vector<2x128xf32>
    %90 = vector.extract_strided_slice %88 {offsets = [0, 128], sizes = [2, 128], strides = [1, 1]} : vector<2x256xf32> to vector<2x128xf32>
    %cst_51 = arith.constant 5.000000e-01 : f32
    %91 = vector.broadcast %cst_51 : f32 to vector<2x128xf32>
    %92 = arith.mulf %91, %90 : vector<2x128xf32>
    %93 = math.exp %92 : vector<2x128xf32>
    %94 = arith.mulf %93, %93 : vector<2x128xf32>
    %95 = arith.mulf %89, %89 : vector<2x128xf32>
    %96 = arith.addf %94, %95 : vector<2x128xf32>
    %cst_52 = arith.constant 0.183939725 : f32
    %97 = vector.broadcast %cst_52 : f32 to vector<2x128xf32>
    %98 = arith.mulf %96, %97 : vector<2x128xf32>
    %cst_53 = arith.constant 5.000000e-01 : f32
    %99 = vector.broadcast %cst_53 : f32 to vector<2x128xf32>
    %100 = arith.mulf %99, %90 : vector<2x128xf32>
    %101 = arith.subf %98, %100 : vector<2x128xf32>
    %102 = vector.shape_cast %101 : vector<2x128xf32> to vector<1x2x128xf32>
    %cst_54 = arith.constant dense<0.000000e+00> : vector<1xf32>
    %103 = vector.multi_reduction <add>, %102, %cst_54 [1, 2] : vector<1x2x128xf32> to vector<1xf32>
    %104 = vector.shape_cast %103 : vector<1xf32> to vector<1x1x1xf32>
    %105 = vector.extract %104[0, 0, 0] : f32 from vector<1x1x1xf32>
    %cst_55 = arith.constant 2.000000e+00 : f32
    %106 = arith.divf %105, %cst_55 : f32
    %c0_56 = arith.constant 0 : index
    %c0_57 = arith.constant 0 : index
    %107 = vector.load %arg3[%c0_56, %c0_57] : memref<2x128xf32, #tpu.memory_space<vmem>>, vector<2x128xf32>
    %108 = arith.mulf %107, %93 : vector<2x128xf32>
    %109 = arith.addf %89, %108 : vector<2x128xf32>
    %c0_58 = arith.constant 0 : index
    %c0_59 = arith.constant 0 : index
    %110 = vector.load %arg21[%c0_58, %c0_59] : memref<128x1xbf16, #tpu.memory_space<vmem>>, vector<128x1xbf16>
    %111 = arith.truncf %109 : vector<2x128xf32> to vector<2x128xbf16>
    %cst_60 = arith.constant dense<0.000000e+00> : vector<2x1xf32>
    %112 = tpu.matmul %111, %110, %cst_60 {dimension_numbers = #tpu.dot_dimension_numbers<[1], [0], [0], [1], [0, 0, 1, 1], [], []>} : vector<2x128xbf16>, vector<128x1xbf16>, vector<2x1xf32> -> vector<2x1xf32>
    %c0_61 = arith.constant 0 : index
    %c0_62 = arith.constant 0 : index
    %113 = vector.load %arg23[%c0_61, %c0_62] : memref<1x1xf32, #tpu.memory_space<vmem>>, vector<1x1xf32>
    %114 = vector.broadcast %113 : vector<1x1xf32> to vector<2x1xf32>
    %115 = arith.addf %112, %114 : vector<2x1xf32>
    %c0_63 = arith.constant 0 : index
    %c0_64 = arith.constant 0 : index
    %116 = vector.load %arg22[%c0_63, %c0_64] : memref<128x1xbf16, #tpu.memory_space<vmem>>, vector<128x1xbf16>
    %117 = arith.truncf %41 : vector<4x128xf32> to vector<4x128xbf16>
    %cst_65 = arith.constant dense<0.000000e+00> : vector<4x1xf32>
    %118 = tpu.matmul %117, %116, %cst_65 {dimension_numbers = #tpu.dot_dimension_numbers<[1], [0], [0], [1], [0, 0, 1, 1], [], []>} : vector<4x128xbf16>, vector<128x1xbf16>, vector<4x1xf32> -> vector<4x1xf32>
    %119 = vector.extract_strided_slice %118 {offsets = [2, 0], sizes = [2, 1], strides = [1, 1]} : vector<4x1xf32> to vector<2x1xf32>
    %120 = arith.addf %115, %119 : vector<2x1xf32>
    %121 = vector.extract_strided_slice %118 {offsets = [0, 0], sizes = [2, 1], strides = [1, 1]} : vector<4x1xf32> to vector<2x1xf32>
    %122 = arith.addf %115, %121 : vector<2x1xf32>
    %123 = math.absf %120 : vector<2x1xf32>
    %cst_66 = arith.constant 0.000000e+00 : f32
    %124 = vector.broadcast %cst_66 : f32 to vector<2x1xf32>
    %125 = arith.subf %124, %123 : vector<2x1xf32>
    %126 = math.exp %125 : vector<2x1xf32>
    %cst_67 = arith.constant 1.000000e+00 : f32
    %127 = vector.broadcast %cst_67 : f32 to vector<2x1xf32>
    %128 = arith.addf %127, %126 : vector<2x1xf32>
    %129 = math.log %128 : vector<2x1xf32>
    %130 = math.absf %122 : vector<2x1xf32>
    %cst_68 = arith.constant 0.000000e+00 : f32
    %131 = vector.broadcast %cst_68 : f32 to vector<2x1xf32>
    %132 = arith.subf %131, %130 : vector<2x1xf32>
    %133 = math.exp %132 : vector<2x1xf32>
    %cst_69 = arith.constant 1.000000e+00 : f32
    %134 = vector.broadcast %cst_69 : f32 to vector<2x1xf32>
    %135 = arith.addf %134, %133 : vector<2x1xf32>
    %136 = math.log %135 : vector<2x1xf32>
    %cst_70 = arith.constant 0.000000e+00 : f32
    %137 = vector.broadcast %cst_70 : f32 to vector<2x1xf32>
    %138 = arith.maximumf %120, %137 : vector<2x1xf32>
    %139 = arith.subf %138, %120 : vector<2x1xf32>
    %140 = arith.addf %139, %129 : vector<2x1xf32>
    %141 = vector.shape_cast %140 : vector<2x1xf32> to vector<1x2x1xf32>
    %cst_71 = arith.constant dense<0.000000e+00> : vector<1xf32>
    %142 = vector.multi_reduction <add>, %141, %cst_71 [1, 2] : vector<1x2x1xf32> to vector<1xf32>
    %143 = vector.shape_cast %142 : vector<1xf32> to vector<1x1x1xf32>
    %144 = vector.extract %143[0, 0, 0] : f32 from vector<1x1x1xf32>
    %cst_72 = arith.constant 2.000000e+00 : f32
    %145 = arith.divf %144, %cst_72 : f32
    %cst_73 = arith.constant 0.000000e+00 : f32
    %146 = vector.broadcast %cst_73 : f32 to vector<2x1xf32>
    %147 = arith.maximumf %122, %146 : vector<2x1xf32>
    %148 = arith.addf %147, %136 : vector<2x1xf32>
    %149 = vector.shape_cast %148 : vector<2x1xf32> to vector<1x2x1xf32>
    %cst_74 = arith.constant dense<0.000000e+00> : vector<1xf32>
    %150 = vector.multi_reduction <add>, %149, %cst_74 [1, 2] : vector<1x2x1xf32> to vector<1xf32>
    %151 = vector.shape_cast %150 : vector<1xf32> to vector<1x1x1xf32>
    %152 = vector.extract %151[0, 0, 0] : f32 from vector<1x1x1xf32>
    %cst_75 = arith.constant 2.000000e+00 : f32
    %153 = arith.divf %152, %cst_75 : f32
    %154 = tpu.iota {dimensions = array<i32: 1>} : vector<16x128xi32>
    %c0_76 = arith.constant 0 : index
    %c0_77 = arith.constant 0 : index
    %155 = vector.load %arg1[%c0_76, %c0_77] : memref<16x1xi32, #tpu.memory_space<vmem>>, vector<16x1xi32>
    %156 = vector.broadcast %155 : vector<16x1xi32> to vector<16x128xi32>
    %157 = arith.cmpi eq, %154, %156 : vector<16x128xi32>
    %158 = arith.extui %157 : vector<16x128xi1> to vector<16x128xi32>
    %159 = arith.sitofp %158 : vector<16x128xi32> to vector<16x128xf32>
    %160 = arith.truncf %159 : vector<16x128xf32> to vector<16x128xbf16>
    %cst_78 = arith.constant dense<0.000000e+00> : vector<16x128xf32>
    %161 = tpu.matmul %160, %0, %cst_78 {dimension_numbers = #tpu.dot_dimension_numbers<[1], [0], [0], [1], [0, 0, 1, 1], [], []>} : vector<16x128xbf16>, vector<128x128xbf16>, vector<16x128xf32> -> vector<16x128xf32>
    %162 = vector.shape_cast %161 : vector<16x128xf32> to vector<2x8x128xf32>
    %163 = vector.shape_cast %1 : vector<8x128xf32> to vector<1x8x128xf32>
    %164 = vector.broadcast %163 : vector<1x8x128xf32> to vector<2x8x128xf32>
    %165 = arith.addf %162, %164 : vector<2x8x128xf32>
    %166 = vector.shape_cast %165 : vector<2x8x128xf32> to vector<16x128xf32>
    %167 = arith.addf %43, %109 : vector<2x128xf32>
    %cst_79 = arith.constant 0.111111112 : f32
    %168 = vector.broadcast %cst_79 : f32 to vector<2x128xf32>
    %169 = arith.mulf %167, %168 : vector<2x128xf32>
    %c0_80 = arith.constant 0 : index
    %c0_81 = arith.constant 0 : index
    %170 = vector.load %arg24[%c0_80, %c0_81] : memref<128x128xbf16, #tpu.memory_space<vmem>>, vector<128x128xbf16>
    %171 = arith.truncf %169 : vector<2x128xf32> to vector<2x128xbf16>
    %cst_82 = arith.constant dense<0.000000e+00> : vector<2x128xf32>
    %172 = tpu.matmul %171, %170, %cst_82 {dimension_numbers = #tpu.dot_dimension_numbers<[1], [0], [0], [1], [0, 0, 1, 1], [], []>} : vector<2x128xbf16>, vector<128x128xbf16>, vector<2x128xf32> -> vector<2x128xf32>
    %c0_83 = arith.constant 0 : index
    %c0_84 = arith.constant 0 : index
    %173 = vector.load %arg25[%c0_83, %c0_84] : memref<1x128xf32, #tpu.memory_space<vmem>>, vector<1x128xf32>
    %174 = vector.broadcast %173 : vector<1x128xf32> to vector<2x128xf32>
    %175 = arith.addf %172, %174 : vector<2x128xf32>
    %c0_85 = arith.constant 0 : index
    %c0_86 = arith.constant 0 : index
    %176 = vector.load %arg26[%c0_85, %c0_86] : memref<128x128xbf16, #tpu.memory_space<vmem>>, vector<128x128xbf16>
    %177 = arith.truncf %166 : vector<16x128xf32> to vector<16x128xbf16>
    %cst_87 = arith.constant dense<0.000000e+00> : vector<16x128xf32>
    %178 = tpu.matmul %177, %176, %cst_87 {dimension_numbers = #tpu.dot_dimension_numbers<[1], [0], [0], [1], [0, 0, 1, 1], [], []>} : vector<16x128xbf16>, vector<128x128xbf16>, vector<16x128xf32> -> vector<16x128xf32>
    %c0_88 = arith.constant 0 : index
    %c0_89 = arith.constant 0 : index
    %179 = vector.load %arg27[%c0_88, %c0_89] : memref<1x128xf32, #tpu.memory_space<vmem>>, vector<1x128xf32>
    %180 = vector.broadcast %179 : vector<1x128xf32> to vector<16x128xf32>
    %181 = arith.addf %178, %180 : vector<16x128xf32>
    %cst_90 = arith.constant 5.000000e-01 : f32
    %182 = vector.broadcast %cst_90 : f32 to vector<16x128xf32>
    %183 = arith.mulf %182, %181 : vector<16x128xf32>
    %cst_91 = arith.constant 4.471500e-02 : f32
    %184 = vector.broadcast %cst_91 : f32 to vector<16x128xf32>
    %185 = arith.mulf %184, %181 : vector<16x128xf32>
    %186 = arith.mulf %185, %181 : vector<16x128xf32>
    %187 = arith.mulf %186, %181 : vector<16x128xf32>
    %188 = arith.addf %181, %187 : vector<16x128xf32>
    %cst_92 = arith.constant 0.797884583 : f32
    %189 = vector.broadcast %cst_92 : f32 to vector<16x128xf32>
    %190 = arith.mulf %189, %188 : vector<16x128xf32>
    %191 = math.tanh %190 : vector<16x128xf32>
    %cst_93 = arith.constant 1.000000e+00 : f32
    %192 = vector.broadcast %cst_93 : f32 to vector<16x128xf32>
    %193 = arith.addf %192, %191 : vector<16x128xf32>
    %194 = arith.mulf %183, %193 : vector<16x128xf32>
    %195 = vector.shape_cast %194 : vector<16x128xf32> to vector<2x8x128xf32>
    %196 = vector.shape_cast %175 : vector<2x128xf32> to vector<2x1x128xf32>
    %197 = vector.broadcast %196 : vector<2x1x128xf32> to vector<2x8x128xf32>
    %198 = arith.addf %195, %197 : vector<2x8x128xf32>
    %199 = vector.shape_cast %198 : vector<2x8x128xf32> to vector<16x128xf32>
    %c0_94 = arith.constant 0 : index
    %c0_95 = arith.constant 0 : index
    %200 = vector.load %arg28[%c0_94, %c0_95] : memref<128x128xbf16, #tpu.memory_space<vmem>>, vector<128x128xbf16>
    %201 = arith.truncf %199 : vector<16x128xf32> to vector<16x128xbf16>
    %cst_96 = arith.constant dense<0.000000e+00> : vector<16x128xf32>
    %202 = tpu.matmul %201, %200, %cst_96 {dimension_numbers = #tpu.dot_dimension_numbers<[1], [0], [0], [1], [0, 0, 1, 1], [], []>} : vector<16x128xbf16>, vector<128x128xbf16>, vector<16x128xf32> -> vector<16x128xf32>
    %c0_97 = arith.constant 0 : index
    %c0_98 = arith.constant 0 : index
    %203 = vector.load %arg29[%c0_97, %c0_98] : memref<1x128xf32, #tpu.memory_space<vmem>>, vector<1x128xf32>
    %204 = vector.broadcast %203 : vector<1x128xf32> to vector<16x128xf32>
    %205 = arith.addf %202, %204 : vector<16x128xf32>
    %206 = arith.truncf %205 : vector<16x128xf32> to vector<16x128xbf16>
    %cst_99 = arith.constant dense<0.000000e+00> : vector<16x128xf32>
    %207 = tpu.matmul %206, %0, %cst_99 {dimension_numbers = #tpu.dot_dimension_numbers<[1], [1], [0], [0], [0, 0, 1, 0], [], []>} : vector<16x128xbf16>, vector<128x128xbf16>, vector<16x128xf32> -> vector<16x128xf32>
    %c0_100 = arith.constant 0 : index
    %c0_101 = arith.constant 0 : index
    %208 = vector.load %arg30[%c0_100, %c0_101] : memref<1x128xf32, #tpu.memory_space<vmem>>, vector<1x128xf32>
    %209 = vector.broadcast %208 : vector<1x128xf32> to vector<16x128xf32>
    %210 = arith.addf %207, %209 : vector<16x128xf32>
    %c0_102 = arith.constant 0 : index
    %c0_103 = arith.constant 0 : index
    %211 = vector.load %arg2[%c0_102, %c0_103] : memref<16x1xi32, #tpu.memory_space<vmem>>, vector<16x1xi32>
    %cst_104 = arith.constant dense<0xFF800000> : vector<16xf32>
    %212 = vector.multi_reduction <maximumf>, %210, %cst_104 [1] : vector<16x128xf32> to vector<16xf32>
    %213 = vector.shape_cast %212 : vector<16xf32> to vector<16x1xf32>
    %214 = vector.broadcast %213 : vector<16x1xf32> to vector<16x128xf32>
    %215 = arith.subf %210, %214 : vector<16x128xf32>
    %216 = math.exp %215 : vector<16x128xf32>
    %cst_105 = arith.constant dense<0.000000e+00> : vector<16xf32>
    %217 = vector.multi_reduction <add>, %216, %cst_105 [1] : vector<16x128xf32> to vector<16xf32>
    %218 = vector.shape_cast %217 : vector<16xf32> to vector<16x1xf32>
    %219 = math.log %218 : vector<16x1xf32>
    %220 = arith.addf %213, %219 : vector<16x1xf32>
    %221 = vector.broadcast %211 : vector<16x1xi32> to vector<16x128xi32>
    %222 = arith.cmpi eq, %154, %221 : vector<16x128xi32>
    %223 = arith.extui %222 : vector<16x128xi1> to vector<16x128xi32>
    %224 = arith.sitofp %223 : vector<16x128xi32> to vector<16x128xf32>
    %225 = arith.mulf %210, %224 : vector<16x128xf32>
    %cst_106 = arith.constant dense<0.000000e+00> : vector<16xf32>
    %226 = vector.multi_reduction <add>, %225, %cst_106 [1] : vector<16x128xf32> to vector<16xf32>
    %227 = vector.shape_cast %226 : vector<16xf32> to vector<16x1xf32>
    %c-100_i32 = arith.constant -100 : i32
    %228 = vector.broadcast %c-100_i32 : i32 to vector<16x1xi32>
    %229 = arith.cmpi ne, %211, %228 : vector<16x1xi32>
    %230 = arith.extui %229 : vector<16x1xi1> to vector<16x1xi32>
    %231 = arith.sitofp %230 : vector<16x1xi32> to vector<16x1xf32>
    %232 = vector.shape_cast %231 : vector<16x1xf32> to vector<1x16x1xf32>
    %cst_107 = arith.constant dense<0.000000e+00> : vector<1xf32>
    %233 = vector.multi_reduction <add>, %232, %cst_107 [1, 2] : vector<1x16x1xf32> to vector<1xf32>
    %234 = vector.shape_cast %233 : vector<1xf32> to vector<1x1x1xf32>
    %235 = vector.extract %234[0, 0, 0] : f32 from vector<1x1x1xf32>
    %cst_108 = arith.constant 1.000000e+00 : f32
    %236 = arith.maximumf %235, %cst_108 : f32
    %237 = arith.subf %220, %227 : vector<16x1xf32>
    %238 = arith.mulf %237, %231 : vector<16x1xf32>
    %239 = vector.shape_cast %238 : vector<16x1xf32> to vector<1x16x1xf32>
    %cst_109 = arith.constant dense<0.000000e+00> : vector<1xf32>
    %240 = vector.multi_reduction <add>, %239, %cst_109 [1, 2] : vector<1x16x1xf32> to vector<1xf32>
    %241 = vector.shape_cast %240 : vector<1xf32> to vector<1x1x1xf32>
    %242 = vector.extract %241[0, 0, 0] : f32 from vector<1x1x1xf32>
    %243 = arith.divf %242, %236 : f32
    %c0_110 = arith.constant 0 : index
    %244 = memref.load %arg5[%c0_110] : memref<3xf32, #tpu.memory_space<smem>>
    %245 = arith.mulf %244, %106 : f32
    %246 = arith.addf %243, %245 : f32
    %c1 = arith.constant 1 : index
    %247 = memref.load %arg5[%c1] : memref<3xf32, #tpu.memory_space<smem>>
    %248 = arith.mulf %247, %145 : f32
    %249 = arith.addf %246, %248 : f32
    %c2 = arith.constant 2 : index
    %250 = memref.load %arg5[%c2] : memref<3xf32, #tpu.memory_space<smem>>
    %251 = arith.mulf %250, %153 : f32
    %252 = arith.addf %249, %251 : f32
    %c0_111 = arith.constant 0 : index
    %253 = memref.load %arg31[%c0_111] : memref<5xf32, #tpu.memory_space<smem>>
    memref.store %252, %arg31[%c0_111] : memref<5xf32, #tpu.memory_space<smem>>
    %c1_112 = arith.constant 1 : index
    %254 = memref.load %arg31[%c1_112] : memref<5xf32, #tpu.memory_space<smem>>
    memref.store %243, %arg31[%c1_112] : memref<5xf32, #tpu.memory_space<smem>>
    %c2_113 = arith.constant 2 : index
    %255 = memref.load %arg31[%c2_113] : memref<5xf32, #tpu.memory_space<smem>>
    memref.store %106, %arg31[%c2_113] : memref<5xf32, #tpu.memory_space<smem>>
    %c3 = arith.constant 3 : index
    %256 = memref.load %arg31[%c3] : memref<5xf32, #tpu.memory_space<smem>>
    memref.store %145, %arg31[%c3] : memref<5xf32, #tpu.memory_space<smem>>
    %c4 = arith.constant 4 : index
    %257 = memref.load %arg31[%c4] : memref<5xf32, #tpu.memory_space<smem>>
    memref.store %153, %arg31[%c4] : memref<5xf32, #tpu.memory_space<smem>>
    return
  }
}

</mosaic_0001>

<bundles_post_ra>
// kernel: forward.1
= control target key start
LH: loop header
LB: loop body
LE: loop exit
PB: predicated region body
PF: predicated region fallthrough
CT: control target
= control target key end

     0   :  { %s3160_s6 = smov 1   ;;  %s3161_s10 = smov 2   ;;  %s3753_s0 = inlined_call_operand.smem [shape: u32[32], index: -1, kind: input, shape index: {}] }
   0x1   :  { %s3211_s5 = sld [smem:[%s3753_s0]]   ;;  %s3162_s14 = smov 3  }
   0x2   :  { %s3216_s9 = sld [smem:[%s3753_s0 + %s3160_s6]]   ;;  %s3163_s18 = smov 4  }
   0x3   :  { %s3221_s13 = sld [smem:[%s3753_s0 + %s3161_s10]]   ;;  %s3164_s22 = smov 5  }
   0x4   :  { %s3226_s17 = sld [smem:[%s3753_s0 + %s3162_s14]]   ;;  %s3165_s26 = smov 6  }
   0x5   :  { %s3231_s21 = sld [smem:[%s3753_s0 + %s3163_s18]]   ;;  %s3166_s30 = smov 7  }
   0x6   :  { %s3236_s25 = sld [smem:[%s3753_s0 + %s3164_s22]]   ;;  %s3167_s4 = smov 8  }
   0x7   :  { %s3241_s29 = sld [smem:[%s3753_s0 + %s3165_s26]]   ;;  %s3168_s10 = smov 9  }
   0x8   :  { %s3246_s3 = sld [smem:[%s3753_s0 + %s3166_s30]]   ;;  %s3169_s15 = smov 10  }
   0x9   :  { %3760 = sst [smem:[#allocation15_spill]] %s3221_s13  ;;  %s3170_s20 = smov 11  }
   0xa   :  { %3761 = sst [smem:[#allocation16_spill]] %s3226_s17  ;;  %s3171_s26 = smov 12  }
   0xb   :  { %s3251_s8 = sld [smem:[%s3753_s0 + %s3167_s4]]   ;;  %s3172_s1 = smov 13  }
   0xc   :  { %s3256_s14 = sld [smem:[%s3753_s0 + %s3168_s10]]   ;;  %s3173_s7 = smov 14  }
   0xd   :  { %s3261_s19 = sld [smem:[%s3753_s0 + %s3169_s15]]   ;;  %s3174_s15 = smov 15  }
   0xe   :  { %s3266_s24 = sld [smem:[%s3753_s0 + %s3170_s20]]   ;;  %s3175_s22 = smov 16  }
   0xf   :  { %s3271_s30 = sld [smem:[%s3753_s0 + %s3171_s26]]   ;;  %s3176_s28 = smov 17  }
  0x10   :  { %s3276_s6 = sld [smem:[%s3753_s0 + %s3172_s1]]   ;;  %s3183_s23 = smov 24  }
  0x11   :  { %s3281_s12 = sld [smem:[%s3753_s0 + %s3173_s7]]   ;;  %s3177_s7 = smov 18  }
  0x12   :  { %s3286_s20 = sld [smem:[%s3753_s0 + %s3174_s15]]   ;;  %s3178_s15 = smov 19  }
  0x13   :  { %s3291_s27 = sld [smem:[%s3753_s0 + %s3175_s22]]   ;;  %s3179_s22 = smov 20  }
  0x14   :  { %3762 = sst [smem:[#allocation17_spill]] %s3266_s24  ;;  %s3184_s1 = smov 25  }
  0x15   :  { %s3296_s4 = sld [smem:[%s3753_s0 + %s3176_s28]]   ;;  %s3180_s28 = smov 21  }
  0x16   :  { %s3301_s13 = sld [smem:[%s3753_s0 + %s3177_s7]]   ;;  %s3181_s7 = smov 22  }
  0x17   :  { %s3306_s17 = sld [smem:[%s3753_s0 + %s3178_s15]]   ;;  %s3182_s15 = smov 23  }
  0x18   :  { %s3316_s24 = sld [smem:[%s3753_s0 + %s3180_s28]]   ;;  %s3185_s10 = smov 26  }
  0x19   :  { %3763 = sst [smem:[#allocation18_spill]] %s3291_s27  ;;  %s3186_s16 = smov 27  }
  0x1a   :  { %s3311_s27 = sld [smem:[%s3753_s0 + %s3179_s22]]  }
  0x1b   :  { %3764 = sst [smem:[#allocation19_spill]] %s3296_s4 }
  0x1c   :  { %3765 = sst [smem:[#allocation20_spill]] %s3301_s13 }
  0x1d   :  { %3766 = sst [smem:[#allocation21_spill]] %s3306_s17 }
  0x1e   :  { %3768 = sst [smem:[#allocation23_spill]] %s3316_s24 }
  0x1f   :  { %s3321_s13 = sld [smem:[%s3753_s0 + %s3181_s7]]  }
  0x20   :  { %3767 = sst [smem:[#allocation22_spill]] %s3311_s27 }
  0x21   :  { %s2328_s17 = sld [smem:[%s3753_s0 + %s3182_s15]]  }
  0x22   :  { %s3329_s27 = sld [smem:[%s3753_s0 + %s3183_s23]]   ;;  %s3187_s23 = smov 28  }
  0x23   :  { %s3334_s24 = sld [smem:[%s3753_s0 + %s3184_s1]]   ;;  %s3188_s1 = smov 29  }
  0x24   :  { %s3344_s4 = sld [smem:[%s3753_s0 + %s3186_s16]]   ;;  %s3190_s16 = smov 31  }
  0x25   :  { %3769 = sst [smem:[#allocation24_spill]] %s3321_s13 }
  0x26   :  { %s3339_s13 = sld [smem:[%s3753_s0 + %s3185_s10]]   ;;  %s3189_s10 = smov 30  }
  0x27   :  { %v68_v0 = vstv %s2328_s17  ;;  %s3359_s15 = sld [smem:[%s3753_s0 + %s3189_s10]]  }
  0x28   :  { %3770 = sst [smem:[#allocation25_spill]] %s3329_s27  ;;  %69 = vst [vmem:[#allocation2] sm:$0x1] %v68_v0 }
  0x29   :  { %3771 = sst [smem:[#allocation26_spill]] %s3334_s24 }
  0x2a   :  { %3772 = sst [smem:[#allocation27_spill]] %s3344_s4 }
  0x2b   :  { %s3349_s27 = sld [smem:[%s3753_s0 + %s3187_s23]]  }
  0x2c   :  { %s3354_s24 = sld [smem:[%s3753_s0 + %s3188_s1]]  }
  0x2d   :  { %s3364_s23 = sld [smem:[%s3753_s0 + %s3190_s16]]  }
  0x2e   :  { %70 = vsyncpa [#allocation5], 0 }
  0x2f   :  { %71 = vsyncpa [#allocation4], 0 }
  0x30   :  { %72 = vsyncpa [#allocation9], 0 }
  0x31   :  { %73 = vsyncpa [#allocation6], 0  ;;  %s90_s22 = sshll.u32 %s3236_s25, 4  ;;  %s91_s22 = int_to_ptr.vmem [resolvable:$true] %s90_s22 }
  0x32   :  { %s3084_s17 = scalar_lea.vmem %s91_s22, 16  ;;  %p3089_p1 = scmp.lt.s32.totalorder %s91_s22, %s91_s22 }
  0x33   :  { %p3085_p0 = scmp.ne.s32.totalorder %s91_s22, %s3084_s17  ;;  %p3090_p2 = scmp.lt.s32.totalorder %s3084_s17, %s3084_s17 }
  0x35   :  { %p3091_p3 = por %p3090_p2, %p3089_p1 }
  0x37   :  { %p3092_p4 = pnand %p3091_p3, %p3085_p0 }
  0x39   :  { %3095 = shalt.err (!%p3092_p4)
}
  0x3a   :  { %s3191_s26 = smov [#allocation3]   ;;  %s3192_s0 = smov [#allocation7]  }
  0x3b   :  { %93 = dma.vmem_to_smem %s91_s22, 16, %s3191_s26, [#allocation5]  }
  0x3c   :  { %s139_s4 = sshll.u32 %s3192_s0, 4  ;;  %s3096_s1 = scalar_lea.hbm %s3339_s13, 1024  ;;  %s140_s4 = int_to_ptr.vmem [resolvable:$true] %s139_s4 }
  0x3d   :  { %p3097_p5 = scmp.ne.s32.totalorder %s3339_s13, %s3096_s1  ;;  %p3100_p6 = scmp.lt.u32.totalorder %s3096_s1, %s3339_s13 }
  0x3f   :  { %p3102_p7 = pnand %p3100_p6, %p3097_p5 }
  0x41   :  { %3105 = shalt.err (!%p3102_p7)
}
  0x42   :  { %s3106_s25 = scalar_lea.vmem %s140_s4, 1024  ;;  %p3111_p9 = scmp.lt.s32.totalorder %s140_s4, %s140_s4 }
  0x43   :  { %p3107_p8 = scmp.ne.s32.totalorder %s140_s4, %s3106_s25  ;;  %p3112_p10 = scmp.lt.s32.totalorder %s3106_s25, %s3106_s25 }
  0x45   :  { %p3113_p11 = por %p3112_p10, %p3111_p9 }
  0x47   :  { %p3114_p12 = pnand %p3113_p11, %p3107_p8 }
  0x49   :  { %3117 = shalt.err (!%p3114_p12)
}
  0x4a   :  { %s3193_s28 = smov 64   ;;  %s3194_s2 = smov 4  }
  0x4b   :  { %145 = dma.hbm_to_vmem [thread:$0]  %s3339_s13, 1024, %s140_s4, [#allocation4], %s3193_s28, %s3193_s28, %s3194_s2  }
  0x4c   :  { %s3195_s10 = smov [#allocation8]   ;;  %s3118_s11 = scalar_lea.hbm %s3349_s27, 1024 }
  0x4d   :  { %s153_s7 = sshll.u32 %s3195_s10, 4  ;;  %p3119_p13 = scmp.ne.s32.totalorder %s3349_s27, %s3118_s11  ;;  %s154_s7 = int_to_ptr.vmem [resolvable:$true] %s153_s7 }
  0x4e   :  { %p3122_p0 = scmp.lt.u32.totalorder %s3118_s11, %s3349_s27 }
  0x50   :  { %p3124_p1 = pnand %p3122_p0, %p3119_p13 }
  0x52   :  { %3127 = shalt.err (!%p3124_p1)
}
  0x53   :  { %s3128_s16 = scalar_lea.vmem %s154_s7, 1024  ;;  %p3133_p3 = scmp.lt.s32.totalorder %s154_s7, %s154_s7 }
  0x54   :  { %p3129_p2 = scmp.ne.s32.totalorder %s154_s7, %s3128_s16  ;;  %p3134_p4 = scmp.lt.s32.totalorder %s3128_s16, %s3128_s16 }
  0x56   :  { %p3135_p5 = por %p3134_p4, %p3133_p3 }
  0x58   :  { %p3136_p6 = pnand %p3135_p5, %p3129_p2 }
  0x5a   :  { %3139 = shalt.err (!%p3136_p6)
}
  0x5b   :  { %159 = dma.hbm_to_vmem [thread:$0]  %s3349_s27, 1024, %s154_s7, [#allocation9], %s3193_s28, %s3193_s28, %s3194_s2  }
  0x5c   :  { %3152 = dma.done.wait [#allocation5], 16  }
  0x5d   :  { %3153 = vsyncadd [#allocation5], 4294967280 }
  0x5e   :  { %3154 = dma.done.wait [#allocation4], 1024  }
  0x5f   :  { %3155 = vsyncadd [#allocation4], 4294966272 }
  0x60   :  { %3156 = dma.done.wait [#allocation9], 1024  }
  0x61   :  { %3157 = vsyncadd [#allocation9], 4294966272 }
  0x62   :  { %173 = sfence }
  0x63   :  { %v196_v1 = vld [vmem:[%s3211_s5 + $0x10] sm:$0xff]  ;;  %v194_v2 = vld [vmem:[%s3211_s5] sm:$0xff]  ;;  %v3196_v3 = vmov 0   ;;  %v197_v4 = vld [vmem:[%s3211_s5 + $0x18] sm:$0xff]  ;;  %v192_v17 = vlaneseq  ;;  %v3197_v24 = vmov 1.0|1.0  }
  0x64   :  { %2878 = vset.pattern.permute.xlu1 %v3196_v3  ;;  %2877 = vset.pattern.permute.xlu0 %v3196_v3  ;;  %v195_v5 = vld [vmem:[%s3211_s5 + $0x8] sm:$0xff]  ;;  %v2879_v6 = vld [vmem:[%s3241_s29] sm:$0xff]   ;;  %v2881_v10 = vld [vmem:[%s3241_s29 + $0x10] sm:$0xff]   ;;  %vm751_vm6 = vcmask 523264   ;;  %vm3199_vm7 = vmmov 0   ;;  %vm798_vm8 = vcmask 1043456  }
  0x65   :  { %205 = vperm.xlu1 %2878, %v196_v1   ;;  %199 = vperm.xlu0 %2877, %v194_v2   ;;  %v2880_v7 = vld [vmem:[%s3241_s29 + $0x8] sm:$0xff]   ;;  %v1674_v9 = vld [vmem:[%s3216_s9] sm:$0xff]  ;;  %v2882_v11 = vld [vmem:[%s3241_s29 + $0x18] sm:$0xff]   ;;  %v3393_v20 = vand.u32 127, %v192_v17  ;;  %v3198_v1 = vmov 0.0   ;;  %s3773_s5 = sld [smem:[#allocation19_spill]] }
  0x66   :  { %2602 = vmatprep.subr.bf16.mxu1 %v2879_v6  ;;  %v1675_v8 = vld [vmem:[%s3216_s9 + $0x8] sm:$0xff]  ;;  %v2883_v12 = vld [vmem:[%s3241_s29 + $0x20] sm:$0xff]   ;;  %v2885_v14 = vld [vmem:[%s3241_s29 + $0x30] sm:$0xff]   ;;  %vm855_vm9 = vcmask 1041409   ;;  %s3774_s9 = sld [smem:[#allocation21_spill]]  ;;  %s3775_s13 = sld [smem:[#allocation17_spill]] }
  0x67   :  { %2603 = vmatpush3.bf16.msra.mxu1 %v2879_v6  ;;  %v2884_v13 = vld [vmem:[%s3241_s29 + $0x28] sm:$0xff]   ;;  %v2886_v15 = vld [vmem:[%s3241_s29 + $0x38] sm:$0xff]   ;;  %v2887_v16 = vld [vmem:[%s3251_s8] sm:$0xff]   ;;  %vm1529_vm10 = vcmask 1042434   ;;  %vm1531_vm11 = vcmask 1043459   ;;  %s3201_s0 = smov 1.0  }
  0x68   :  { %2604 = vmatprep.subr.bf16.mxu1 %v2880_v7  ;;  %v2888_v23 = vld [vmem:[%s3251_s8 + $0x8] sm:$0xff]   ;;  %v2889_v25 = vld [vmem:[%s3251_s8 + $0x10] sm:$0xff]   ;;  %v2890_v26 = vld [vmem:[%s3251_s8 + $0x18] sm:$0xff]   ;;  %s2269_s1 = sld [smem:[#allocation3]]  ;;  %s2498_s25 = sld [smem:[#allocation3 + $0x1]] }
  0x69   :  { %208 = vperm.xlu1 %2878, %v197_v4   ;;  %202 = vperm.xlu0 %2877, %v195_v5   ;;  %v2891_v27 = vld [vmem:[%s3251_s8 + $0x20] sm:$0xff]   ;;  %v2892_v28 = vld [vmem:[%s3251_s8 + $0x28] sm:$0xff]   ;;  %v2893_v29 = vld [vmem:[%s3251_s8 + $0x30] sm:$0xff]   ;;  %s2499_s28 = sld [smem:[#allocation3 + $0x2]] }
  0x6a   :  { %v2894_v30 = vld [vmem:[%s3251_s8 + $0x38] sm:$0xff]   ;;  %v191_v31 = vld [vmem:[%s3246_s3] sm:$0xff]  ;;  %v2896_v45 = vld [vmem:[%s3271_s30 + $0x8] sm:$0xff]   ;;  %s3777_s8 = sld [smem:[#allocation23_spill]] }
  0x6b   :  { %2605 = vmatpush3.bf16.msra.mxu1 %v2880_v7  ;;  %v641_v38 = vld [vmem:[%s3231_s21] sm:$0xff]  ;;  %v2897_v46 = vld [vmem:[%s3271_s30 + $0x10] sm:$0xff]   ;;  %v2898_v47 = vld [vmem:[%s3271_s30 + $0x18] sm:$0xff]   ;;  %s3776_s21 = sld [smem:[#allocation18_spill]] }
  0x6c   :  { %2606 = vmatprep.subr.bf16.mxu1 %v2881_v10  ;;  %v2895_v43 = vld [vmem:[%s3271_s30] sm:$0xff]   ;;  %v2373_v44 = vcombine.high %v641_v38, %v641_v38  ;;  %v2900_v49 = vld [vmem:[%s3271_s30 + $0x28] sm:$0xff]   ;;  %v2901_v50 = vld [vmem:[%s3271_s30 + $0x30] sm:$0xff]   ;;  %v2372_v56 = vcombine.low %v641_v38, %v641_v38 }
  0x6d   :  { %1680 = vperm.xlu1 %2878, %v1675_v8   ;;  %1677 = vperm.xlu0 %2877, %v1674_v9   ;;  %v2899_v48 = vld [vmem:[%s3271_s30 + $0x20] sm:$0xff]   ;;  %v2902_v51 = vld [vmem:[%s3271_s30 + $0x38] sm:$0xff]   ;;  %v2904_v53 = vld [vmem:[%s3271_s30 + $0x48] sm:$0xff]  }
  0x6e   :  { %v2903_v52 = vld [vmem:[%s3271_s30 + $0x40] sm:$0xff]   ;;  %v2905_v54 = vld [vmem:[%s3271_s30 + $0x50] sm:$0xff]   ;;  %v2906_v55 = vld [vmem:[%s3271_s30 + $0x58] sm:$0xff]   ;;  %s3781_s30 = sld [smem:[#allocation24_spill]] }
  0x6f   :  { %2607 = vmatpush3.bf16.msra.mxu1 %v2881_v10  ;;  %v2909_v57 = vld [vmem:[%s3261_s19] sm:$0xff]   ;;  %v2910_v58 = vld [vmem:[%s3261_s19 + $0x8] sm:$0xff]   ;;  %v2911_v59 = vld [vmem:[%s3261_s19 + $0x10] sm:$0xff]  }
  0x70   :  { %2608 = vmatprep.subr.bf16.mxu1 %v2882_v11  ;;  %2642 = vmatprep.subr.bf16.mxu0 %v2909_v57  ;;  %v2912_v60 = vld [vmem:[%s3261_s19 + $0x18] sm:$0xff]   ;;  %v2913_v61 = vld [vmem:[%s3261_s19 + $0x20] sm:$0xff]   ;;  %v2914_v62 = vld [vmem:[%s3261_s19 + $0x28] sm:$0xff]  }
  0x71   :  { %2643 = vmatpush3.bf16.msra.mxu0 %v2909_v57  ;;  %v2915_v63 = vld [vmem:[%s3261_s19 + $0x30] sm:$0xff]   ;;  %v2916_v0 = vld [vmem:[%s3261_s19 + $0x38] sm:$0xff]   ;;  %v2353_v2 = vld [vmem:[%s3256_s14] ss:$0 sm:$0xff]  ;;  %s3778_s14 = sld [smem:[#allocation20_spill]]  ;;  %s3780_s19 = sld [smem:[#allocation16_spill]] }
  0x72   :  { %2644 = vmatprep.subr.bf16.mxu0 %v2910_v58  ;;  %v2921_v57 = vld [vmem:[%s3286_s20 + $0x20] sm:$0xff]  }
  0x73   :  { %2609 = vmatpush3.bf16.msra.mxu1 %v2882_v11 }
  0x74   :  { %2610 = vmatprep.subr.bf16.mxu1 %v2883_v12 }
  0x75   :  { %2645 = vmatpush3.bf16.msra.mxu0 %v2910_v58 }
  0x76   :  { %2646 = vmatprep.subr.bf16.mxu0 %v2911_v59 }
  0x77   :  { %2611 = vmatpush3.bf16.msra.mxu1 %v2883_v12 }
  0x78   :  { %2612 = vmatprep.subr.bf16.mxu1 %v2884_v13 }
  0x79   :  { %2647 = vmatpush3.bf16.msra.mxu0 %v2911_v59 }
  0x7a   :  { %2648 = vmatprep.subr.bf16.mxu0 %v2912_v60 }
  0x7b   :  { %2613 = vmatpush3.bf16.msra.mxu1 %v2884_v13 }
  0x7c   :  { %2614 = vmatprep.subr.bf16.mxu1 %v2885_v14 }
  0x7d   :  { %2649 = vmatpush3.bf16.msra.mxu0 %v2912_v60 }
  0x7e   :  { %2650 = vmatprep.subr.bf16.mxu0 %v2913_v61 }
  0x7f   :  { %2615 = vmatpush3.bf16.msra.mxu1 %v2885_v14 }
  0x80   :  { %2616 = vmatprep.subr.bf16.mxu1 %v2886_v15 }
  0x81   :  { %2651 = vmatpush3.bf16.msra.mxu0 %v2913_v61 }
  0x82   :  { %2652 = vmatprep.subr.bf16.mxu0 %v2914_v62 }
  0x83   :  { %2617 = vmatpush3.bf16.msra.mxu1 %v2886_v15 }
  0x84   :  { %2622 = vmatprep.subr.bf16.mxu1 %v2887_v16 }
  0x85   :  { %2653 = vmatpush3.bf16.msra.mxu0 %v2914_v62 }
  0x86   :  { %2654 = vmatprep.subr.bf16.mxu0 %v2915_v63 }
  0x89   :  { %2655 = vmatpush3.bf16.msra.mxu0 %v2915_v63 }
  0x8a   :  { %2656 = vmatprep.subr.bf16.mxu0 %v2916_v0 }
  0x8d   :  { %2657 = vmatpush3.bf16.msra.mxu0 %v2916_v0 }
  0x8e   :  { %2662 = vmatprep.subr.bf16.mxu0 %v3198_v1 }
  0xe4   :  { %v206_v18 = vpop.permute.xlu1 %205  ;;  %v200_v19 = vpop.permute.xlu0 %199 }
  0xe5   :  { %vm212_vm0 = vcmp.eq.s32.totalorder %v3393_v20, %v206_v18  ;;  %vm210_vm3 = vcmp.eq.s32.totalorder %v3393_v20, %v200_v19 }
  0xe8   :  { %v209_v21 = vpop.permute.xlu1 %208  ;;  %v203_v22 = vpop.permute.xlu0 %202 }
  0xe9   :  { %vm213_vm1 = vcmp.eq.s32.totalorder %v3393_v20, %v209_v21  ;;  %vm211_vm2 = vcmp.eq.s32.totalorder %v3393_v20, %v203_v22 }
  0xea   :  { %vm2351_vm4 = vmpackc.low %vm213_vm1, %vm212_vm0  ;;  %vm1371_vm1 = vcmask 1041408  }
  0xeb   :  { %vm2349_vm5 = vmpackc.low %vm211_vm2, %vm210_vm3 }
  0xec   :  { %2618 = vmatprep.mubr.msk.bf16.mxu1 %vm2349_vm5, %v3197_v24  ;;  %vm2235_vm5 = vcmask 7168  }
  0xed   :  { %2619 = vmatmul.mubr.msk.bf16.vlgmr.msra.gmra.mrb[0].mxu1 %vm2351_vm4, %v3197_v24  ;;  %vm1645_vm4 = vcmask 1024  }
  0xee   :  { %2623 = vmatpush3.bf16.msra.mxu1 %v2887_v16 }
  0xef   :  { %2624 = vmatprep.subr.bf16.mxu1 %v2888_v23 }
  0xf2   :  { %2625 = vmatpush3.bf16.msra.mxu1 %v2888_v23 }
  0xf3   :  { %2626 = vmatprep.subr.bf16.mxu1 %v2889_v25 }
  0xf6   :  { %2627 = vmatpush3.bf16.msra.mxu1 %v2889_v25 }
  0xf7   :  { %2628 = vmatprep.subr.bf16.mxu1 %v2890_v26 }
  0xfa   :  { %2629 = vmatpush3.bf16.msra.mxu1 %v2890_v26 }
  0xfb   :  { %2630 = vmatprep.subr.bf16.mxu1 %v2891_v27 }
  0xfe   :  { %2631 = vmatpush3.bf16.msra.mxu1 %v2891_v27 }
  0xff   :  { %2632 = vmatprep.subr.bf16.mxu1 %v2892_v28 }
 0x102   :  { %2633 = vmatpush3.bf16.msra.mxu1 %v2892_v28 }
 0x103   :  { %2634 = vmatprep.subr.bf16.mxu1 %v2893_v29 }
 0x106   :  { %2635 = vmatpush3.bf16.msra.mxu1 %v2893_v29 }
 0x107   :  { %2636 = vmatprep.subr.bf16.mxu1 %v2894_v30 }
 0x10a   :  { %2637 = vmatpush3.bf16.msra.mxu1 %v2894_v30 }
 0x10b   :  { %755 = vmatprep.subr.bf16.mxu1 %v3196_v3 }
 0x1c0   :  { %v2620_v32 = vpop.f32.mrb[0].mxu1 }
 0x1c1   :  { %v306_v33 = vpop.f32.mrb[1].mxu1  ;;  %v323_v35 = vadd.f32 %v2620_v32, %v191_v31 }
 0x1c2   :  { %v2621_v34 = vpop.f32.mrb[2].mxu1  ;;  %v321_v39 = vadd.f32 %v306_v33, %v191_v31 }
 0x1c3   :  { %v324_v36 = vadd.f32 %v2621_v34, %v191_v31  ;;  %v309_v37 = vpop.f32.mrb[3].mxu1 }
 0x1c4   :  { %v322_v40 = vadd.f32 %v309_v37, %v191_v31 }
 0x1c5   :  { %v342_v41 = vpack.c.bf16 %v324_v36, %v323_v35 }
 0x1c6   :  { %v341_v42 = vpack.c.bf16 %v322_v40, %v321_v39 }
 0x1c8   :  { %2638 = vmatprep.mubr.bf16.mxu1 %v341_v42 }
 0x1c9   :  { %2639 = vmatmul.mubr.bf16.vlgmr.msra.gmra.mrb[4].mxu1 %v342_v41 }
 0x1ca   :  { %756 = vmatpush1.bf16.msra.mxu1 %v2895_v43  ;;  %2386 = vmatprep.mubr.msk.bf16.mxu1 %vm751_vm6, %v2373_v44 }
 0x1cb   :  { %757 = vmatprep.subr.bf16.mxu1 %v3196_v3 }
 0x1ce   :  { %758 = vmatpush1.bf16.msra.mxu1 %v2896_v45 }
 0x1cf   :  { %759 = vmatprep.subr.bf16.mxu1 %v3196_v3 }
 0x1d2   :  { %760 = vmatpush1.bf16.msra.mxu1 %v2897_v46 }
 0x1d3   :  { %761 = vmatprep.subr.bf16.mxu1 %v3196_v3 }
 0x1d6   :  { %762 = vmatpush1.bf16.msra.mxu1 %v2898_v47 }
 0x1d7   :  { %763 = vmatprep.subr.bf16.mxu1 %v3196_v3 }
 0x1da   :  { %764 = vmatpush1.bf16.msra.mxu1 %v2899_v48 }
 0x1db   :  { %765 = vmatprep.subr.bf16.mxu1 %v3196_v3 }
 0x1de   :  { %766 = vmatpush1.bf16.msra.mxu1 %v2900_v49 }
 0x1df   :  { %767 = vmatprep.subr.bf16.mxu1 %v3196_v3 }
 0x1e2   :  { %768 = vmatpush1.bf16.msra.mxu1 %v2901_v50 }
 0x1e3   :  { %769 = vmatprep.subr.bf16.mxu1 %v3196_v3 }
 0x1e6   :  { %770 = vmatpush1.bf16.msra.mxu1 %v2902_v51 }
 0x1e7   :  { %771 = vmatprep.subr.bf16.mxu1 %v3196_v3 }
 0x1ea   :  { %772 = vmatpush1.bf16.msra.mxu1 %v2903_v52  ;;  %v2917_v52 = vld [vmem:[%s3286_s20] sm:$0xff]  }
 0x1eb   :  { %773 = vmatprep.subr.bf16.mxu1 %v3196_v3 }
 0x1ee   :  { %774 = vmatpush1.bf16.msra.mxu1 %v2904_v53  ;;  %v2918_v53 = vld [vmem:[%s3286_s20 + $0x8] sm:$0xff]  }
 0x1ef   :  { %775 = vmatprep.subr.bf16.mxu1 %v3196_v3 }
 0x1f2   :  { %776 = vmatpush1.bf16.msra.mxu1 %v2905_v54  ;;  %v2919_v54 = vld [vmem:[%s3286_s20 + $0x10] sm:$0xff]  }
 0x1f3   :  { %777 = vmatprep.subr.bf16.mxu1 %v3196_v3 }
 0x1f6   :  { %778 = vmatpush1.bf16.msra.mxu1 %v2906_v55  ;;  %v2920_v55 = vld [vmem:[%s3286_s20 + $0x18] sm:$0xff]  }
 0x1f9   :  { %788 = vmatmul.mubr.bf16.vlgmr.msra.gmra.mrb[8].mxu1 %v2372_v56  ;;  %v2371_v56 = vld [vmem:[%s3276_s6] ss:$0 sm:$0xff]  ;;  %s3782_s6 = sld [smem:[#allocation25_spill]] }
 0x1fa   :  { %1089 = vmatprep.mubr.bf16.mxu1 %v3196_v3 }
 0x29c   :  { %v2640_v3 = vpop.f32.mrb[4].mxu1 }
 0x29d   :  { %v441_v4 = vadd.f32 %v2640_v3, %v2353_v2  ;;  %v432_v5 = vpop.f32.mrb[5].mxu1 }
 0x29e   :  { %v433_v6 = vadd.f32 %v2353_v2, %v432_v5  ;;  %v2641_v7 = vpop.f32.mrb[6].mxu1 }
 0x29f   :  { %v453_v8 = vmul.f32 0.044715, %v441_v4  ;;  %v444_v9 = vadd.f32 %v2641_v7, %v2353_v2  ;;  %v435_v10 = vpop.f32.mrb[7].mxu1  ;;  %v449_v40 = vmul.f32 0.5, %v441_v4  ;;  %v2923_v7 = vld [vmem:[%s3286_s20 + $0x30] sm:$0xff]  }
 0x2a0   :  { %v451_v11 = vmul.f32 0.044715, %v433_v6  ;;  %v436_v12 = vadd.f32 %v2353_v2, %v435_v10  ;;  %v447_v43 = vmul.f32 0.5, %v433_v6  ;;  %v2922_v2 = vld [vmem:[%s3286_s20 + $0x28] sm:$0xff]  }
 0x2a1   :  { %v457_v13 = vmul.f32 %v453_v8, %v441_v4  ;;  %v454_v14 = vmul.f32 0.044715, %v444_v9  ;;  %v450_v41 = vmul.f32 0.5, %v444_v9 }
 0x2a2   :  { %v452_v15 = vmul.f32 0.044715, %v436_v12  ;;  %v455_v16 = vmul.f32 %v451_v11, %v433_v6  ;;  %v448_v44 = vmul.f32 0.5, %v436_v12 }
 0x2a3   :  { %v461_v18 = vmul.f32 %v457_v13, %v441_v4  ;;  %v458_v19 = vmul.f32 %v454_v14, %v444_v9 }
 0x2a4   :  { %v456_v21 = vmul.f32 %v452_v15, %v436_v12  ;;  %v459_v22 = vmul.f32 %v455_v16, %v433_v6 }
 0x2a5   :  { %v462_v23 = vmul.f32 %v458_v19, %v444_v9  ;;  %v465_v25 = vadd.f32 %v461_v18, %v441_v4  ;;  %v2387_v18 = vld [vmem:[%s3281_s12] ss:$0 sm:$0xff]  ;;  %s3784_s12 = sld [smem:[#allocation26_spill]] }
 0x2a6   :  { %v460_v26 = vmul.f32 %v456_v21, %v436_v12  ;;  %v463_v27 = vadd.f32 %v459_v22, %v433_v6 }
 0x2a7   :  { %v466_v28 = vadd.f32 %v462_v23, %v444_v9  ;;  %v469_v29 = vmul.f32 0.7978846, %v465_v25 }
 0x2a8   :  { %v464_v30 = vadd.f32 %v460_v26, %v436_v12  ;;  %v467_v31 = vmul.f32 0.7978846, %v463_v27  ;;  %v2924_v12 = vld [vmem:[%s3286_s20 + $0x38] sm:$0xff]   ;;  %s3785_s20 = sld [smem:[#allocation15_spill]] }
 0x2a9   :  { %v470_v32 = vmul.f32 0.7978846, %v466_v28  ;;  %3037 = vtanh.f32 %v469_v29 }
 0x2aa   :  { %v468_v33 = vmul.f32 0.7978846, %v464_v30  ;;  %3039 = vtanh.f32 %v467_v31 }
 0x2ab   :  { %3041 = vtanh.f32 %v470_v32 }
 0x2ac   :  { %3043 = vtanh.f32 %v468_v33  ;;  %v2925_v33 = vld [vmem:[%s3773_s5] ss:$8 sps:$4 sm:$0xff]  }
 0x2b3   :  { %v3038_v34 = vpop.eup %3037 }
 0x2b4   :  { %v3040_v35 = vpop.eup %3039  ;;  %v477_v36 = vadd.f32 1.0, %v3038_v34  ;;  %v2927_v34 = vld [vmem:[%s3773_s5 + $0x4] ss:$8 sps:$4 sm:$0xff]  }
 0x2b5   :  { %v3042_v37 = vpop.eup %3041  ;;  %v475_v38 = vadd.f32 1.0, %v3040_v35  ;;  %v2930_v35 = vld [vmem:[%s3773_s5 + $0x14] ss:$8 sps:$4 sm:$0xff]   ;;  %1057 = vmatprep.subr.bf16.mxu1 %v2927_v34 }
 0x2b6   :  { %v3044_v39 = vpop.eup %3043  ;;  %v478_v42 = vadd.f32 1.0, %v3042_v37  ;;  %v481_v46 = vmul.f32 %v477_v36, %v449_v40  ;;  %1058 = vmatpush1.bf16.msra.mxu1 %v2925_v33  ;;  %v2928_v36 = vld [vmem:[%s3773_s5 + $0x10] ss:$8 sps:$4 sm:$0xff]   ;;  %v2933_v37 = vld [vmem:[%s3773_s5 + $0x24] ss:$8 sps:$4 sm:$0xff]  }
 0x2b7   :  { %v476_v45 = vadd.f32 1.0, %v3044_v39  ;;  %v479_v48 = vmul.f32 %v475_v38, %v447_v43  ;;  %1059 = vmatprep.subr.bf16.mxu1 %v2930_v35  ;;  %v2931_v38 = vld [vmem:[%s3773_s5 + $0x20] ss:$8 sps:$4 sm:$0xff]   ;;  %v2936_v39 = vld [vmem:[%s3773_s5 + $0x34] ss:$8 sps:$4 sm:$0xff]  }
 0x2b8   :  { %v482_v47 = vmul.f32 %v478_v42, %v450_v41  ;;  %v2934_v40 = vld [vmem:[%s3773_s5 + $0x30] ss:$8 sps:$4 sm:$0xff]   ;;  %v2939_v41 = vld [vmem:[%s3773_s5 + $0x44] ss:$8 sps:$4 sm:$0xff]   ;;  %v2937_v42 = vld [vmem:[%s3773_s5 + $0x40] ss:$8 sps:$4 sm:$0xff]  }
 0x2b9   :  { %v480_v49 = vmul.f32 %v476_v45, %v448_v44  ;;  %v2942_v43 = vld [vmem:[%s3773_s5 + $0x54] ss:$8 sps:$4 sm:$0xff]   ;;  %v2940_v44 = vld [vmem:[%s3773_s5 + $0x50] ss:$8 sps:$4 sm:$0xff]   ;;  %v2945_v45 = vld [vmem:[%s3773_s5 + $0x64] ss:$8 sps:$4 sm:$0xff]  }
 0x2ba   :  { %v500_v50 = vpack.c.bf16 %v482_v47, %v481_v46  ;;  %1060 = vmatpush1.bf16.msra.mxu1 %v2928_v36  ;;  %v2943_v46 = vld [vmem:[%s3773_s5 + $0x60] ss:$8 sps:$4 sm:$0xff]   ;;  %v2948_v47 = vld [vmem:[%s3773_s5 + $0x74] ss:$8 sps:$4 sm:$0xff]  }
 0x2bb   :  { %v499_v51 = vpack.c.bf16 %v480_v49, %v479_v48  ;;  %1061 = vmatprep.subr.bf16.mxu1 %v2933_v37  ;;  %v2946_v48 = vld [vmem:[%s3773_s5 + $0x70] ss:$8 sps:$4 sm:$0xff]   ;;  %v2949_v49 = vld [vmem:[%s3774_s9] ss:$8 sps:$4 sm:$0xff]  }
 0x2bd   :  { %2658 = vmatprep.mubr.bf16.mxu0 %v499_v51  ;;  %v2954_v51 = vld [vmem:[%s3774_s9 + $0x14] ss:$8 sps:$4 sm:$0xff]  }
 0x2be   :  { %2659 = vmatmul.mubr.bf16.vlgmr.msra.gmra.mrb[0].mxu0 %v500_v50  ;;  %1062 = vmatpush1.bf16.msra.mxu1 %v2931_v38  ;;  %v2951_v50 = vld [vmem:[%s3774_s9 + $0x4] ss:$8 sps:$4 sm:$0xff]  }
 0x2bf   :  { %2663 = vmatpush3.bf16.msra.mxu0 %v2917_v52  ;;  %2678 = vmatprep.mubr.msk.bf16.mxu0 %vm3199_vm7, %v3198_v1  ;;  %v2952_v52 = vld [vmem:[%s3774_s9 + $0x10] ss:$8 sps:$4 sm:$0xff]  }
 0x2c0   :  { %2664 = vmatprep.subr.bf16.mxu0 %v3198_v1  ;;  %1063 = vmatprep.subr.bf16.mxu1 %v2936_v39 }
 0x2c2   :  { %1064 = vmatpush1.bf16.msra.mxu1 %v2934_v40 }
 0x2c3   :  { %2665 = vmatpush3.bf16.msra.mxu0 %v2918_v53  ;;  %1065 = vmatprep.subr.bf16.mxu1 %v2939_v41  ;;  %v2957_v53 = vld [vmem:[%s3774_s9 + $0x24] ss:$8 sps:$4 sm:$0xff]  }
 0x2c4   :  { %2666 = vmatprep.subr.bf16.mxu0 %v3198_v1 }
 0x2c6   :  { %1066 = vmatpush1.bf16.msra.mxu1 %v2937_v42 }
 0x2c7   :  { %2667 = vmatpush3.bf16.msra.mxu0 %v2919_v54  ;;  %1067 = vmatprep.subr.bf16.mxu1 %v2942_v43  ;;  %v2955_v54 = vld [vmem:[%s3774_s9 + $0x20] ss:$8 sps:$4 sm:$0xff]  }
 0x2c8   :  { %2668 = vmatprep.subr.bf16.mxu0 %v3198_v1 }
 0x2ca   :  { %1068 = vmatpush1.bf16.msra.mxu1 %v2940_v44 }
 0x2cb   :  { %2669 = vmatpush3.bf16.msra.mxu0 %v2920_v55  ;;  %1069 = vmatprep.subr.bf16.mxu1 %v2945_v45  ;;  %v2960_v55 = vld [vmem:[%s3774_s9 + $0x34] ss:$8 sps:$4 sm:$0xff]  }
 0x2cc   :  { %v789_v58 = vpop.f32.mrb[8].mxu1  ;;  %2670 = vmatprep.subr.bf16.mxu0 %v3198_v1 }
 0x2cd   :  { %v790_v59 = vadd.f32 %v2371_v56, %v789_v58  ;;  %v791_v60 = vpop.f32.mrb[9].mxu1  ;;  %v2958_v56 = vld [vmem:[%s3774_s9 + $0x30] ss:$8 sps:$4 sm:$0xff]   ;;  %v2961_v58 = vld [vmem:[%s3774_s9 + $0x40] ss:$8 sps:$4 sm:$0xff]  }
 0x2ce   :  { %v792_v61 = vpop.f32.mrb[10].mxu1  ;;  %1070 = vmatpush1.bf16.msra.mxu1 %v2943_v46  ;;  %v2964_v60 = vld [vmem:[%s3774_s9 + $0x50] ss:$8 sps:$4 sm:$0xff]  }
 0x2cf   :  { %v796_v62 = vcombine.high %v790_v59, %v790_v59  ;;  %v799_v63 = vsel %vm798_vm8, %v790_v59, 0.0  ;;  %v793_v0 = vpop.f32.mrb[11].mxu1  ;;  %2671 = vmatpush3.bf16.msra.mxu0 %v2921_v57  ;;  %1071 = vmatprep.subr.bf16.mxu1 %v2948_v47  ;;  %v2963_v57 = vld [vmem:[%s3774_s9 + $0x44] ss:$8 sps:$4 sm:$0xff]   ;;  %v2966_v59 = vld [vmem:[%s3774_s9 + $0x54] ss:$8 sps:$4 sm:$0xff]  }
 0x2d0   :  { %v800_v3 = vrot.slane %v799_v63, 4  ;;  %2672 = vmatprep.subr.bf16.mxu0 %v3198_v1  ;;  %v2969_v61 = vld [vmem:[%s3774_s9 + $0x64] ss:$8 sps:$4 sm:$0xff]   ;;  %v2970_v0 = vld [vmem:[%s3774_s9 + $0x70] ss:$8 sps:$4 sm:$0xff]  }
 0x2d1   :  { %v806_v4 = vsel %vm798_vm8, %v796_v62, 0.0  ;;  %v2967_v62 = vld [vmem:[%s3774_s9 + $0x60] ss:$8 sps:$4 sm:$0xff]  }
 0x2d2   :  { %v801_v5 = vadd.f32 %v800_v3, %v799_v63  ;;  %v807_v6 = vrot.slane %v806_v4, 4  ;;  %1072 = vmatpush1.bf16.msra.mxu1 %v2946_v48  ;;  %v2972_v63 = vld [vmem:[%s3774_s9 + $0x74] ss:$8 sps:$4 sm:$0xff]   ;;  %v2973_v3 = vld [vmem:[%s3774_s9 + $0x80] ss:$8 sps:$4 sm:$0xff]  }
 0x2d3   :  { %2673 = vmatpush3.bf16.msra.mxu0 %v2922_v2  ;;  %2682 = vmatprep.subr.bf16.mxu1 %v3198_v1  ;;  %v2975_v2 = vld [vmem:[%s3774_s9 + $0x84] ss:$8 sps:$4 sm:$0xff]  }
 0x2d4   :  { %v802_v8 = vrot.slane %v801_v5, 2  ;;  %v808_v9 = vadd.f32 %v807_v6, %v806_v4  ;;  %2674 = vmatprep.subr.bf16.mxu0 %v3198_v1  ;;  %v2362_v4 = vld [vmem:[%s3775_s13] ss:$0 sm:$0xff] }
 0x2d6   :  { %v803_v10 = vadd.f32 %v802_v8, %v801_v5  ;;  %v809_v11 = vrot.slane %v808_v9, 2 }
 0x2d7   :  { %2675 = vmatpush3.bf16.msra.mxu0 %v2923_v7 }
 0x2d8   :  { %v804_v13 = vrot.slane %v803_v10, 1  ;;  %v810_v14 = vadd.f32 %v809_v11, %v808_v9  ;;  %2676 = vmatprep.subr.bf16.mxu0 %v3198_v1 }
 0x2da   :  { %v805_v15 = vadd.f32 %v804_v13, %v803_v10  ;;  %v811_v16 = vrot.slane %v810_v14, 1 }
 0x2db   :  { %2677 = vmatpush3.bf16.msra.mxu0 %v2924_v12 }
 0x2dc   :  { %v812_v19 = vadd.f32 %v811_v16, %v810_v14  ;;  %v814_v21 = vmul.f32 0.25, %v805_v15  ;;  %1322 = vmatprep.subr.bf16.mxu0 %v2951_v50 }
 0x2de   :  { %v815_v22 = vmul.f32 0.25, %v812_v19  ;;  %v823_v23 = vadd.f32 %v2387_v18, %v814_v21 }
 0x2e0   :  { %v824_v25 = vadd.f32 %v2387_v18, %v815_v22  ;;  %v841_v26 = vpack.c.bf16 %v823_v23, %v823_v23 }
 0x2e2   :  { %v842_v27 = vpack.c.bf16 %v824_v25, %v824_v25  ;;  %v852_v29 = vunpack.c.l.b16 %v841_v26 }
 0x2e4   :  { %v853_v28 = vunpack.c.l.b16 %v842_v27 }
 0x2e6   :  { %v854_v30 = vrot.slane %v853_v28, 7 }
 0x2e8   :  { %v856_v31 = vsel %vm855_vm9, %v854_v30, %v852_v29 }
 0x2e9   :  { %v857_v32 = vpack.c.b16 %v856_v31, %v856_v31 }
 0x2eb   :  { %2679 = vmatmul.mubr.bf16.vlgmr.msra.gmra.mrb[4].mxu0 %v857_v32 }
 0x2ec   :  { %1323 = vmatpush1.bf16.msra.mxu0 %v2949_v49 }
 0x2ed   :  { %1324 = vmatprep.subr.bf16.mxu0 %v2954_v51  ;;  %v2388_v51 = vld [vmem:[%s3776_s21] ss:$0 sm:$0xff] }
 0x2f0   :  { %1325 = vmatpush1.bf16.msra.mxu0 %v2952_v52 }
 0x2f1   :  { %1326 = vmatprep.subr.bf16.mxu0 %v2957_v53 }
 0x2f4   :  { %1327 = vmatpush1.bf16.msra.mxu0 %v2955_v54 }
 0x2f5   :  { %1328 = vmatprep.subr.bf16.mxu0 %v2960_v55 }
 0x2f8   :  { %1329 = vmatpush1.bf16.msra.mxu0 %v2958_v56 }
 0x2f9   :  { %1330 = vmatprep.subr.bf16.mxu0 %v2963_v57 }
 0x2fc   :  { %1331 = vmatpush1.bf16.msra.mxu0 %v2961_v58 }
 0x2fd   :  { %1332 = vmatprep.subr.bf16.mxu0 %v2966_v59  ;;  %v2978_v59 = vld [vmem:[%s3774_s9 + $0x94] ss:$8 sps:$4 sm:$0xff]  }
 0x300   :  { %1333 = vmatpush1.bf16.msra.mxu0 %v2964_v60  ;;  %v2976_v60 = vld [vmem:[%s3774_s9 + $0x90] ss:$8 sps:$4 sm:$0xff]  }
 0x301   :  { %1334 = vmatprep.subr.bf16.mxu0 %v2969_v61  ;;  %v2981_v61 = vld [vmem:[%s3774_s9 + $0xa4] ss:$8 sps:$4 sm:$0xff]  }
 0x304   :  { %1335 = vmatpush1.bf16.msra.mxu0 %v2967_v62  ;;  %v2979_v62 = vld [vmem:[%s3774_s9 + $0xa0] ss:$8 sps:$4 sm:$0xff]  }
 0x305   :  { %1336 = vmatprep.subr.bf16.mxu0 %v2972_v63  ;;  %v2982_v63 = vld [vmem:[%s3774_s9 + $0xb0] ss:$8 sps:$4 sm:$0xff]  }
 0x308   :  { %1337 = vmatpush1.bf16.msra.mxu0 %v2970_v0  ;;  %v2984_v0 = vld [vmem:[%s3774_s9 + $0xb4] ss:$8 sps:$4 sm:$0xff]  }
 0x309   :  { %1338 = vmatprep.subr.bf16.mxu0 %v2975_v2  ;;  %v2987_v2 = vld [vmem:[%s3774_s9 + $0xc4] ss:$8 sps:$4 sm:$0xff]  }
 0x30c   :  { %1339 = vmatpush1.bf16.msra.mxu0 %v2973_v3  ;;  %v2985_v3 = vld [vmem:[%s3774_s9 + $0xc0] ss:$8 sps:$4 sm:$0xff]  }
 0x30d   :  { %1340 = vmatprep.subr.bf16.mxu0 %v2978_v59  ;;  %v3582_v59 = vld [vmem:[%s3241_s29 + $0x30] sm:$0xff]  }
 0x310   :  { %1341 = vmatpush1.bf16.msra.mxu0 %v2976_v60  ;;  %v3589_v60 = vld [vmem:[%s3241_s29 + $0x38] sm:$0xff]  }
 0x311   :  { %1342 = vmatprep.subr.bf16.mxu0 %v2981_v61  ;;  %v2999_v61 = vld [vmem:[%s3777_s8 + $0x10] sm:$0xff]  }
 0x314   :  { %1343 = vmatpush1.bf16.msra.mxu0 %v2979_v62  ;;  %v3000_v62 = vld [vmem:[%s3777_s8 + $0x18] sm:$0xff]  }
 0x315   :  { %1344 = vmatprep.subr.bf16.mxu0 %v2984_v0  ;;  %v3002_v0 = vld [vmem:[%s3777_s8 + $0x20] sm:$0xff]  }
 0x318   :  { %1345 = vmatpush1.bf16.msra.mxu0 %v2982_v63  ;;  %v3001_v63 = vld [vmem:[#allocation7] sm:$0xff]  }
 0x319   :  { %1346 = vmatprep.subr.bf16.mxu0 %v2987_v2  ;;  %v3003_v2 = vld [vmem:[#allocation7 + $0x8] sm:$0xff]  }
 0x31c   :  { %1347 = vmatpush1.bf16.msra.mxu0 %v2985_v3  ;;  %v3005_v3 = vld [vmem:[#allocation7 + $0x10] sm:$0xff]  }
 0x391   :  { %v2660_v5 = vpop.f32.mrb[0].mxu0 }
 0x392   :  { %v599_v6 = vadd.f32 %v2660_v5, %v2362_v4  ;;  %v590_v7 = vpop.f32.mrb[1].mxu0  ;;  %v2988_v5 = vld [vmem:[%s3774_s9 + $0xd0] ss:$8 sps:$4 sm:$0xff]  }
 0x393   :  { %v3501_v8 = vadd.f32 %v2362_v4, %v590_v7  ;;  %v2661_v9 = vpop.f32.mrb[2].mxu0  ;;  %v2991_v7 = vld [vmem:[%s3774_s9 + $0xe0] ss:$8 sps:$4 sm:$0xff]  }
 0x394   :  { %v617_v10 = vrot.slane %v599_v6, 4  ;;  %v602_v11 = vadd.f32 %v2661_v9, %v2362_v4  ;;  %v593_v12 = vpop.f32.mrb[3].mxu0  ;;  %v2996_v9 = vld [vmem:[%s3774_s9 + $0xf4] ss:$8 sps:$4 sm:$0xff]  }
 0x395   :  { %v605_v13 = vrot.slane %v3501_v8, 4  ;;  %v3504_v14 = vadd.f32 %v2362_v4, %v593_v12  ;;  %v2990_v4 = vld [vmem:[%s3774_s9 + $0xd4] ss:$8 sps:$4 sm:$0xff]   ;;  %v2998_v12 = vld [vmem:[%s3777_s8 + $0x8] sm:$0xff]  }
 0x396   :  { %v618_v15 = vmin.f32 %v599_v6, %v617_v10  ;;  %v623_v16 = vrot.slane %v602_v11, 4  ;;  %1348 = vmatprep.subr.bf16.mxu0 %v2990_v4  ;;  %v2993_v6 = vld [vmem:[%s3774_s9 + $0xe4] ss:$8 sps:$4 sm:$0xff]   ;;  %v2994_v10 = vld [vmem:[%s3774_s9 + $0xf0] ss:$8 sps:$4 sm:$0xff]   ;;  %s2294_s9 = sshll.u32 %s3364_s23, 4  ;;  %s2295_s9 = int_to_ptr.vmem [resolvable:$true] %s2294_s9 }
 0x397   :  { %v606_v18 = vmin.f32 %v3501_v8, %v605_v13  ;;  %v611_v19 = vrot.slane %v3504_v14, 4  ;;  %1349 = vmatpush1.bf16.msra.mxu0 %v2988_v5  ;;  %v3006_v4 = vld [vmem:[%s3777_s8 + $0x30] sm:$0xff]   ;;  %v3007_v5 = vld [vmem:[#allocation7 + $0x18] sm:$0xff]   ;;  %p3145_p8 = scmp.lt.s32.totalorder %s2295_s9, %s2295_s9 }
 0x398   :  { %v619_v21 = vrot.slane %v618_v15, 2  ;;  %v624_v22 = vmin.f32 %v602_v11, %v623_v16  ;;  %1350 = vmatprep.subr.bf16.mxu0 %v2993_v6  ;;  %v2997_v11 = vld [vmem:[%s3777_s8] sm:$0xff]   ;;  %v3008_v6 = vld [vmem:[%s3777_s8 + $0x38] sm:$0xff]  }
 0x399   :  { %v607_v23 = vrot.slane %v606_v18, 2  ;;  %v612_v25 = vmin.f32 %v3504_v14, %v611_v19 }
 0x39a   :  { %v620_v26 = vmin.f32 %v618_v15, %v619_v21  ;;  %v625_v27 = vrot.slane %v624_v22, 2  ;;  %v3539_v15 = vshrl.u32 %v192_v17, 7 }
 0x39b   :  { %v608_v28 = vmin.f32 %v606_v18, %v607_v23  ;;  %v613_v29 = vrot.slane %v612_v25, 2  ;;  %1351 = vmatpush1.bf16.msra.mxu0 %v2991_v7  ;;  %v965_v18 = vld [vmem:[%s3778_s14] sm:$0x3]  ;;  %s3140_s14 = scalar_lea.vmem %s2295_s9, 16 }
 0x39c   :  { %v621_v30 = vrot.slane %v620_v26, 1  ;;  %v626_v31 = vmin.f32 %v624_v22, %v625_v27  ;;  %1352 = vmatprep.subr.bf16.mxu0 %v2996_v9  ;;  %v3542_v16 = vsub.s32 0, %v3539_v15  ;;  %v973_v21 = vsub.s32 1, %v3539_v15  ;;  %v3009_v7 = vld [vmem:[#allocation7 + $0x20] sm:$0xff]   ;;  %v3011_v9 = vld [vmem:[#allocation7 + $0x28] sm:$0xff]   ;;  %p3141_p7 = scmp.ne.s32.totalorder %s2295_s9, %s3140_s14  ;;  %p3146_p9 = scmp.lt.s32.totalorder %s3140_s14, %s3140_s14 }
 0x39d   :  { %v609_v32 = vrot.slane %v608_v28, 1  ;;  %v614_v33 = vmin.f32 %v612_v25, %v613_v29 }
 0x39e   :  { %v622_v34 = vmin.f32 %v620_v26, %v621_v30  ;;  %v627_v35 = vrot.slane %v626_v31, 1  ;;  %v970_v22 = vrot.slane %v965_v18, %v3542_v16  ;;  %v974_v23 = vrot.slane %v965_v18, %v973_v21  ;;  %p3147_p10 = por %p3146_p9, %p3145_p8 }
 0x39f   :  { %v610_v36 = vmin.f32 %v608_v28, %v609_v32  ;;  %v615_v37 = vrot.slane %v614_v33, 1  ;;  %1353 = vmatpush1.bf16.msra.mxu0 %v2994_v10  ;;  %v3013_v10 = vld [vmem:[#allocation7 + $0x30] sm:$0xff]  }
 0x3a0   :  { %v628_v38 = vmin.f32 %v626_v31, %v627_v35  ;;  %v1518_v41 = vpack.c.bf16 %v622_v34, %v622_v34  ;;  %2722 = vmatprep.subr.bf16.mxu0 %v3198_v1  ;;  %p3148_p11 = pnand %p3147_p10, %p3141_p7 }
 0x3a1   :  { %v1516_v39 = vpack.c.bf16 %v610_v36, %v610_v36  ;;  %v616_v40 = vmin.f32 %v614_v33, %v615_v37 }
 0x3a2   :  { %v1519_v42 = vpack.c.bf16 %v628_v38, %v628_v38  ;;  %v1526_v46 = vunpack.c.l.b16 %v1518_v41 }
 0x3a3   :  { %v1517_v43 = vpack.c.bf16 %v616_v40, %v616_v40  ;;  %v1524_v44 = vunpack.c.l.b16 %v1516_v39 }
 0x3a4   :  { %v1527_v47 = vunpack.c.l.b16 %v1519_v42 }
 0x3a5   :  { %v1525_v45 = vunpack.c.l.b16 %v1517_v43 }
 0x3a7   :  { %v1528_v48 = vsel %vm855_vm9, %v1525_v45, %v1524_v44 }
 0x3a8   :  { %v1530_v49 = vsel %vm1529_vm10, %v1526_v46, %v1528_v48 }
 0x3a9   :  { %v3514_v50 = vsel %vm1531_vm11, %v1527_v47, %v1530_v49 }
 0x3be   :  { %v941_v52 = vpop.f32.mrb[4].mxu0 }
 0x3bf   :  { %v942_v53 = vadd.f32 %v2388_v51, %v941_v52  ;;  %v2680_v54 = vpop.f32.mrb[5].mxu0  ;;  %v3550_v51 = vld [vmem:[%s3241_s29] sm:$0xff]   ;;  %v3557_v52 = vld [vmem:[%s3241_s29 + $0x8] sm:$0xff]  }
 0x3c0   :  { %v944_v55 = vpop.f32.mrb[6].mxu0  ;;  %v3567_v54 = vld [vmem:[%s3241_s29 + $0x18] sm:$0xff]  }
 0x3c1   :  { %3045 = vtanh.f32 %v942_v53  ;;  %v2681_v56 = vpop.f32.mrb[7].mxu0  ;;  %v3562_v53 = vld [vmem:[%s3241_s29 + $0x10] sm:$0xff]   ;;  %v3572_v55 = vld [vmem:[%s3241_s29 + $0x20] sm:$0xff]  }
 0x3c2   :  { %v3577_v56 = vld [vmem:[%s3241_s29 + $0x28] sm:$0xff]   ;;  %s3779_s29 = sld [smem:[#allocation22_spill]] }
 0x3cb   :  { %v3046_v57 = vpop.eup %3045 }
 0x3cc   :  { %v964_v58 = vpack.c.bf16 %v3046_v57, %v3046_v57  ;;  %v1681_v57 = vpop.permute.xlu1 %1680 }
 0x3cd   :  { %vm1683_vm12 = vcmp.eq.s32.totalorder %v3393_v20, %v1681_v57 }
 0x3ce   :  { %1090 = vmatmul.mubr.bf16.vlgmr.msra.gmra.mrb[12].mxu1 %v964_v58  ;;  %v1678_v58 = vpop.permute.xlu0 %1677 }
 0x3cf   :  { %2698 = vmatprep.mubr.msk.bf16.mxu1 %vm3199_vm7, %v3198_v1  ;;  %2683 = vmatpush3.bf16.msra.mxu1 %v2997_v11  ;;  %vm1682_vm13 = vcmp.eq.s32.totalorder %v3393_v20, %v1678_v58  ;;  %v3015_v11 = vld [vmem:[#allocation7 + $0x38] sm:$0xff]   ;;  %v3012_v58 = vld [vmem:[%s3781_s30 + $0x8] sm:$0xff]  }
 0x3d0   :  { %2684 = vmatprep.subr.bf16.mxu1 %v3198_v1  ;;  %vm2464_vm14 = vmpackc.low %vm1683_vm12, %vm1682_vm13 }
 0x3d3   :  { %2685 = vmatpush3.bf16.msra.mxu1 %v2998_v12  ;;  %v1150_v12 = vld [vmem:[%s3779_s29] sm:$0x3] }
 0x3d4   :  { %2686 = vmatprep.subr.bf16.mxu1 %v3198_v1  ;;  %v1159_v18 = vrot.slane %v1150_v12, %v973_v21 }
 0x3d7   :  { %2687 = vmatpush3.bf16.msra.mxu1 %v2999_v61 }
 0x3d8   :  { %2688 = vmatprep.subr.bf16.mxu1 %v3198_v1 }
 0x3db   :  { %2689 = vmatpush3.bf16.msra.mxu1 %v3000_v62 }
 0x3dc   :  { %2690 = vmatprep.subr.bf16.mxu1 %v3198_v1 }
 0x3df   :  { %2691 = vmatpush3.bf16.msra.mxu1 %v3002_v0  ;;  %v3014_v0 = vld [vmem:[%s3781_s30 + $0x10] sm:$0xff]  }
 0x3e0   :  { %2692 = vmatprep.subr.bf16.mxu1 %v3198_v1 }
 0x4a1   :  { %v1091_v25 = vpop.f32.mrb[12].mxu1 }
 0x4a2   :  { %v1092_v26 = vadd.f32 %v1091_v25, %v970_v22  ;;  %v1093_v27 = vpop.f32.mrb[13].mxu1 }
 0x4a3   :  { %v1094_v28 = vadd.f32 %v1093_v27, %v974_v23  ;;  %v1095_v29 = vpop.f32.mrb[14].mxu1 }
 0x4a4   :  { %v1100_v30 = vmul.f32 0.044715, %v1092_v26  ;;  %v1096_v31 = vpop.f32.mrb[15].mxu1  ;;  %v1098_v42 = vmul.f32 0.5, %v1092_v26  ;;  %v630_v29 = vadd.f32 %v605_v13, %v3501_v8 }
 0x4a5   :  { %v1101_v17 = vmul.f32 0.044715, %v1094_v28  ;;  %v1099_v44 = vmul.f32 0.5, %v1094_v28 }
 0x4a6   :  { %v1102_v32 = vmul.f32 %v1100_v30, %v1092_v26  ;;  %v636_v30 = vadd.f32 %v611_v19, %v3504_v14  ;;  %v631_v21 = vrot.slane %v630_v29, 2 }
 0x4a7   :  { %v1103_v33 = vmul.f32 %v1101_v17, %v1094_v28 }
 0x4a8   :  { %v1104_v34 = vmul.f32 %v1102_v32, %v1092_v26  ;;  %v637_v17 = vrot.slane %v636_v30, 2  ;;  %v1155_v32 = vrot.slane %v1150_v12, %v3542_v16 }
 0x4a9   :  { %v1105_v35 = vmul.f32 %v1103_v33, %v1094_v28  ;;  %v632_v33 = vadd.f32 %v631_v21, %v630_v29  ;;  %v1533_v29 = vpack.c.b16 %v3514_v50, %v3514_v50  ;;  %v3024_v50 = vld [vmem:[%s3782_s6 + $0x18] sm:$0xff]  }
 0x4aa   :  { %v1106_v36 = vadd.f32 %v1104_v34, %v1092_v26  ;;  %v638_v34 = vadd.f32 %v637_v17, %v636_v30  ;;  %v3023_v30 = vld [vmem:[%s3782_s6 + $0x10] sm:$0xff]   ;;  %v3028_v21 = vld [vmem:[%s3782_s6 + $0x38] sm:$0xff]  }
 0x4ab   :  { %v1107_v37 = vadd.f32 %v1105_v35, %v1094_v28  ;;  %v3030_v17 = vld [vmem:[#allocation8 + $0x8] sm:$0xff]  }
 0x4ac   :  { %v1108_v38 = vmul.f32 0.7978846, %v1106_v36  ;;  %v1385_v36 = vld [vmem:[%s3780_s19] sm:$0x3] }
 0x4ad   :  { %v1109_v39 = vmul.f32 0.7978846, %v1107_v37  ;;  %v633_v37 = vrot.slane %v632_v33, 1 }
 0x4ae   :  { %3047 = vtanh.f32 %v1108_v38 }
 0x4af   :  { %3049 = vtanh.f32 %v1109_v39  ;;  %v639_v39 = vrot.slane %v638_v34, 1  ;;  %v634_v14 = vadd.f32 %v633_v37, %v632_v33  ;;  %v3032_v33 = vld [vmem:[#allocation8 + $0x18] sm:$0xff]  }
 0x4b8   :  { %v3048_v40 = vpop.eup %3047 }
 0x4b9   :  { %v3050_v41 = vpop.eup %3049  ;;  %v1112_v43 = vadd.f32 1.0, %v3048_v40 }
 0x4ba   :  { %v1113_v45 = vadd.f32 1.0, %v3050_v41 }
 0x4bb   :  { %v1114_v46 = vmul.f32 %v1112_v43, %v1098_v42  ;;  %v640_v42 = vadd.f32 %v639_v39, %v638_v34  ;;  %v3010_v43 = vld [vmem:[%s3781_s30] sm:$0xff]   ;;  %v3035_v34 = vld [vmem:[#allocation8 + $0x30] sm:$0xff]  }
 0x4bc   :  { %v1115_v47 = vmul.f32 %v1113_v45, %v1099_v44 }
 0x4bd   :  { %v1148_v49 = vpack.c.bf16 %v1114_v46, %v1114_v46 }
 0x4be   :  { %v1149_v48 = vpack.c.bf16 %v1115_v47, %v1115_v47 }
 0x4c0   :  { %1354 = vmatprep.mubr.bf16.mxu0 %v1149_v48 }
 0x4c1   :  { %1355 = vmatmul.mubr.bf16.vlgmr.msra.gmra.mrb[8].mxu0 %v1148_v49 }
 0x4c2   :  { %2723 = vmatpush3.bf16.msra.mxu0 %v3550_v51  ;;  %2738 = vmatprep.mubr.msk.bf16.mxu0 %vm3199_vm7, %v3198_v1 }
 0x4c3   :  { %2724 = vmatprep.subr.bf16.mxu0 %v3198_v1 }
 0x4c6   :  { %2725 = vmatpush3.bf16.msra.mxu0 %v3557_v52 }
 0x4c7   :  { %2726 = vmatprep.subr.bf16.mxu0 %v3198_v1 }
 0x4ca   :  { %2727 = vmatpush3.bf16.msra.mxu0 %v3562_v53 }
 0x4cb   :  { %2728 = vmatprep.subr.bf16.mxu0 %v3198_v1 }
 0x4ce   :  { %2729 = vmatpush3.bf16.msra.mxu0 %v3567_v54 }
 0x4cf   :  { %2730 = vmatprep.subr.bf16.mxu0 %v3198_v1 }
 0x4d2   :  { %2731 = vmatpush3.bf16.msra.mxu0 %v3572_v55 }
 0x4d3   :  { %2732 = vmatprep.subr.bf16.mxu0 %v3198_v1 }
 0x4d6   :  { %2733 = vmatpush3.bf16.msra.mxu0 %v3577_v56 }
 0x4d7   :  { %2734 = vmatprep.subr.bf16.mxu0 %v3198_v1 }
 0x4da   :  { %2735 = vmatpush3.bf16.msra.mxu0 %v3582_v59 }
 0x4db   :  { %2736 = vmatprep.subr.bf16.mxu0 %v3198_v1 }
 0x4de   :  { %2737 = vmatpush3.bf16.msra.mxu0 %v3589_v60 }
 0x4df   :  { %2762 = vmatprep.subr.bf16.mxu0 %v3198_v1 }
 0x4e1   :  { %2739 = vmatmul.mubr.msk.bf16.vlgmr.msra.gmra.mrb[12].mxu0 %vm2464_vm14, %v3197_v24  ;;  %v3004_v24 = vld [vmem:[%s3777_s8 + $0x28] sm:$0xff]  }
 0x4e2   :  { %2778 = vmatprep.mubr.msk.bf16.mxu0 %vm3199_vm7, %v3198_v1  ;;  %2763 = vmatpush3.bf16.msra.mxu0 %v3001_v63 }
 0x4e3   :  { %2764 = vmatprep.subr.bf16.mxu0 %v3198_v1  ;;  %2693 = vmatpush3.bf16.msra.mxu1 %v3004_v24 }
 0x4e4   :  { %2694 = vmatprep.subr.bf16.mxu1 %v3198_v1 }
 0x4e6   :  { %2765 = vmatpush3.bf16.msra.mxu0 %v3003_v2 }
 0x4e7   :  { %2766 = vmatprep.subr.bf16.mxu0 %v3198_v1  ;;  %2695 = vmatpush3.bf16.msra.mxu1 %v3006_v4 }
 0x4e8   :  { %2696 = vmatprep.subr.bf16.mxu1 %v3198_v1 }
 0x4ea   :  { %2767 = vmatpush3.bf16.msra.mxu0 %v3005_v3 }
 0x4eb   :  { %2768 = vmatprep.subr.bf16.mxu0 %v3198_v1  ;;  %2697 = vmatpush3.bf16.msra.mxu1 %v3008_v6 }
 0x4ec   :  { %2702 = vmatprep.subr.bf16.mxu1 %v3198_v1 }
 0x4ee   :  { %2769 = vmatpush3.bf16.msra.mxu0 %v3007_v5 }
 0x4ef   :  { %2770 = vmatprep.subr.bf16.mxu0 %v3198_v1 }
 0x4f2   :  { %2771 = vmatpush3.bf16.msra.mxu0 %v3009_v7  ;;  %v3016_v7 = vld [vmem:[%s3781_s30 + $0x18] sm:$0xff]  }
 0x4f3   :  { %2772 = vmatprep.subr.bf16.mxu0 %v3198_v1 }
 0x4f6   :  { %2773 = vmatpush3.bf16.msra.mxu0 %v3011_v9  ;;  %v3083_v9 = vld [vmem:[%s3246_s3] sm:$0xff]  ;;  %s3783_s3 = sld [smem:[#allocation27_spill]] }
 0x4f7   :  { %2774 = vmatprep.subr.bf16.mxu0 %v3198_v1 }
 0x4fa   :  { %2775 = vmatpush3.bf16.msra.mxu0 %v3013_v10 }
 0x4fb   :  { %2776 = vmatprep.subr.bf16.mxu0 %v3198_v1 }
 0x4fe   :  { %2777 = vmatpush3.bf16.msra.mxu0 %v3015_v11 }
 0x4ff   :  { %2802 = vmatprep.subr.bf16.mxu0 %v3198_v1 }
 0x594   :  { %v1356_v22 = vpop.f32.mrb[8].mxu0 }
 0x595   :  { %v1358_v23 = vpop.f32.mrb[9].mxu0  ;;  %v1357_v35 = vadd.f32 %v1356_v22, %v1155_v32  ;;  %v3031_v32 = vld [vmem:[#allocation8 + $0x10] sm:$0xff]  }
 0x596   :  { %v1359_v25 = vadd.f32 %v1358_v23, %v1159_v18  ;;  %v1360_v26 = vpop.f32.mrb[10].mxu0  ;;  %v3017_v23 = vld [vmem:[%s3781_s30 + $0x20] sm:$0xff]  }
 0x597   :  { %v1361_v27 = vpop.f32.mrb[11].mxu0  ;;  %v1367_v8 = vmul.f32 %v1357_v35, %v1357_v35  ;;  %v3019_v26 = vld [vmem:[%s3781_s30 + $0x30] sm:$0xff]  }
 0x598   :  { %v3619_v28 = vmul.f32 0.5, %v1359_v25  ;;  %v3018_v25 = vld [vmem:[%s3781_s30 + $0x28] sm:$0xff]   ;;  %v3021_v27 = vld [vmem:[%s3782_s6] sm:$0xff]  }
 0x59a   :  { %v1364_v31 = vmul.f32 1.442695, %v3619_v28 }
 0x59c   :  { %3051 = vpow2.f32 %v1364_v31  ;;  %v3026_v31 = vld [vmem:[%s3782_s6 + $0x28] sm:$0xff]  }
 0x5a6   :  { %v3052_v38 = vpop.eup %3051 }
 0x5a7   :  { %v1386_v13 = vmul.f32 %v3052_v38, %v1385_v36  ;;  %v1366_v40 = vmul.f32 %v3052_v38, %v3052_v38 }
 0x5a9   :  { %v1387_v19 = vadd.f32 %v1386_v13, %v1357_v35  ;;  %v1368_v41 = vadd.f32 %v1367_v8, %v1366_v40  ;;  %v3036_v35 = vld [vmem:[#allocation8 + $0x38] sm:$0xff]  }
 0x5ab   :  { %v1404_v44 = vpack.c.bf16 %v1387_v19, %v1387_v19  ;;  %v1733_v45 = vrot.slane %v1387_v19, 1  ;;  %v1736_v46 = vadd.f32 %v1387_v19, %v634_v14  ;;  %v3631_v47 = vmul.f32 0.18393973, %v1368_v41  ;;  %v2475_v19 = vld [vmem:[%s3783_s3] ss:$0 sm:$0xff] }
 0x5ac   :  { %v2445_v41 = vld [vmem:[#allocation2] ss:$0 sm:$0xff] }
 0x5ad   :  { %2699 = vmatmul.mubr.bf16.vlgmr.msra.gmra.mrb[16].mxu1 %v1404_v44  ;;  %v1737_v48 = vadd.f32 %v1733_v45, %v640_v42  ;;  %v1738_v49 = vmul.f32 0.11111111, %v1736_v46  ;;  %v1370_v57 = vsub.f32 %v3631_v47, %v3619_v28 }
 0x5ae   :  { %2703 = vmatpush3.bf16.msra.mxu1 %v3010_v43  ;;  %2718 = vmatprep.mubr.msk.bf16.mxu1 %vm3199_vm7, %v3198_v1 }
 0x5af   :  { %2704 = vmatprep.subr.bf16.mxu1 %v3198_v1  ;;  %v1739_v61 = vmul.f32 0.11111111, %v1737_v48  ;;  %v1756_v62 = vpack.c.bf16 %v1738_v49, %v1738_v49 }
 0x5b1   :  { %v1757_v63 = vpack.c.bf16 %v1739_v61, %v1739_v61  ;;  %v1767_v4 = vunpack.c.l.b16 %v1756_v62 }
 0x5b2   :  { %2705 = vmatpush3.bf16.msra.mxu1 %v3012_v58 }
 0x5b3   :  { %2706 = vmatprep.subr.bf16.mxu1 %v3198_v1  ;;  %v1768_v2 = vunpack.c.l.b16 %v1757_v63 }
 0x5b4   :  { %v1723_v24 = vpop.f32.mrb[12].mxu0 }
 0x5b5   :  { %v2740_v3 = vpop.f32.mrb[13].mxu0  ;;  %v1769_v5 = vrot.slane %v1768_v2, 7  ;;  %v1730_v10 = vadd.f32 %v3083_v9, %v1723_v24 }
 0x5b6   :  { %2707 = vmatpush3.bf16.msra.mxu1 %v3014_v0  ;;  %v1726_v6 = vpop.f32.mrb[14].mxu0 }
 0x5b7   :  { %v1731_v11 = vadd.f32 %v3083_v9, %v1726_v6  ;;  %v2741_v12 = vpop.f32.mrb[15].mxu0  ;;  %2708 = vmatprep.subr.bf16.mxu1 %v3198_v1  ;;  %v1770_v18 = vsel %vm855_vm9, %v1769_v5, %v1767_v4 }
 0x5b9   :  { %v1877_v22 = vpack.c.bf16 %v1731_v11, %v1730_v10  ;;  %v3200_v10 = vmov 1966171168  }
 0x5ba   :  { %2709 = vmatpush3.bf16.msra.mxu1 %v3016_v7  ;;  %v1994_v11 = vunpack.c.l.s4 %v3200_v10 }
 0x5bb   :  { %2779 = vmatmul.mubr.bf16.vlgmr.msra.gmra.mrb[16].mxu0 %v1877_v22  ;;  %2710 = vmatprep.subr.bf16.mxu1 %v3198_v1 }
 0x5bc   :  { %2803 = vmatpush3.bf16.xpose.msra.mxu0 %v3550_v51  ;;  %2818 = vmatprep.mubr.msk.bf16.mxu0 %vm3199_vm7, %v3198_v1  ;;  %v3020_v51 = vld [vmem:[%s3781_s30 + $0x38] sm:$0xff]   ;;  %v1995_v12 = vunpack.c.0.s8 %v1994_v11 }
 0x5bd   :  { %2804 = vmatprep.subr.bf16.mxu0 %v3198_v1 }
 0x5be   :  { %2711 = vmatpush3.bf16.msra.mxu1 %v3017_v23  ;;  %v1998_v22 = vsub.s32 %v1995_v12, %v3539_v15 }
 0x5bf   :  { %2712 = vmatprep.subr.bf16.mxu1 %v3198_v1 }
 0x5c2   :  { %2713 = vmatpush3.bf16.msra.mxu1 %v3018_v25 }
 0x5c3   :  { %2714 = vmatprep.subr.bf16.mxu1 %v3198_v1 }
 0x5c4   :  { %2805 = vmatpush3.bf16.xpose.msra.mxu0 %v3557_v52  ;;  %v3022_v52 = vld [vmem:[%s3782_s6 + $0x8] sm:$0xff]  }
 0x5c5   :  { %2806 = vmatprep.subr.bf16.mxu0 %v3198_v1 }
 0x5c6   :  { %2715 = vmatpush3.bf16.msra.mxu1 %v3019_v26 }
 0x5c7   :  { %2716 = vmatprep.subr.bf16.mxu1 %v3198_v1 }
 0x5ca   :  { %2717 = vmatpush3.bf16.msra.mxu1 %v3020_v51 }
 0x5cb   :  { %2742 = vmatprep.subr.bf16.mxu1 %v3198_v1 }
 0x5cc   :  { %2807 = vmatpush3.bf16.xpose.msra.mxu0 %v3562_v53  ;;  %v3025_v53 = vld [vmem:[%s3782_s6 + $0x20] sm:$0xff]  }
 0x5cd   :  { %2719 = vmatmul.mubr.bf16.vlgmr.msra.gmra.mrb[20].mxu1 %v1533_v29  ;;  %2808 = vmatprep.subr.bf16.mxu0 %v3198_v1 }
 0x5ce   :  { %2743 = vmatpush3.bf16.msra.mxu1 %v3021_v27  ;;  %2758 = vmatprep.mubr.msk.bf16.mxu1 %vm3199_vm7, %v3198_v1 }
 0x5cf   :  { %2744 = vmatprep.subr.bf16.mxu1 %v3198_v1 }
 0x5d2   :  { %2745 = vmatpush3.bf16.msra.mxu1 %v3022_v52 }
 0x5d3   :  { %2746 = vmatprep.subr.bf16.mxu1 %v3198_v1 }
 0x5d4   :  { %2809 = vmatpush3.bf16.xpose.msra.mxu0 %v3567_v54  ;;  %v3027_v54 = vld [vmem:[%s3782_s6 + $0x30] sm:$0xff]  }
 0x5d5   :  { %2810 = vmatprep.subr.bf16.mxu0 %v3198_v1 }
 0x5d6   :  { %2747 = vmatpush3.bf16.msra.mxu1 %v3023_v30 }
 0x5d7   :  { %2748 = vmatprep.subr.bf16.mxu1 %v3198_v1 }
 0x5da   :  { %2749 = vmatpush3.bf16.msra.mxu1 %v3024_v50 }
 0x5db   :  { %2750 = vmatprep.subr.bf16.mxu1 %v3198_v1 }
 0x5dc   :  { %2811 = vmatpush3.bf16.xpose.msra.mxu0 %v3572_v55  ;;  %v1771_v55 = vpack.c.b16 %v1770_v18, %v1770_v18  ;;  %v2466_v18 = vld [vmem:[%s3784_s12] ss:$0 sm:$0xff] }
 0x5dd   :  { %2812 = vmatprep.subr.bf16.mxu0 %v3198_v1 }
 0x5de   :  { %2751 = vmatpush3.bf16.msra.mxu1 %v3025_v53 }
 0x5df   :  { %2752 = vmatprep.subr.bf16.mxu1 %v3198_v1 }
 0x5e2   :  { %2753 = vmatpush3.bf16.msra.mxu1 %v3026_v31 }
 0x5e3   :  { %2754 = vmatprep.subr.bf16.mxu1 %v3198_v1 }
 0x5e4   :  { %2813 = vmatpush3.bf16.xpose.msra.mxu0 %v3577_v56  ;;  %v3029_v56 = vld [vmem:[#allocation8] sm:$0xff]  }
 0x5e5   :  { %2814 = vmatprep.subr.bf16.mxu0 %v3198_v1 }
 0x5e6   :  { %2755 = vmatpush3.bf16.msra.mxu1 %v3027_v54 }
 0x5e7   :  { %2756 = vmatprep.subr.bf16.mxu1 %v3198_v1 }
 0x5ea   :  { %2757 = vmatpush3.bf16.msra.mxu1 %v3028_v21 }
 0x5eb   :  { %2782 = vmatprep.subr.bf16.mxu1 %v3198_v1 }
 0x5ec   :  { %2815 = vmatpush3.bf16.xpose.msra.mxu0 %v3582_v59  ;;  %v3033_v59 = vld [vmem:[#allocation8 + $0x20] sm:$0xff]  }
 0x5ed   :  { %2759 = vmatmul.mubr.bf16.vlgmr.msra.gmra.mrb[24].mxu1 %v1771_v55  ;;  %2816 = vmatprep.subr.bf16.mxu0 %v3198_v1 }
 0x5ee   :  { %2798 = vmatprep.mubr.msk.bf16.mxu1 %vm3199_vm7, %v3198_v1  ;;  %2783 = vmatpush3.bf16.msra.mxu1 %v3029_v56 }
 0x5ef   :  { %2784 = vmatprep.subr.bf16.mxu1 %v3198_v1 }
 0x5f2   :  { %2785 = vmatpush3.bf16.msra.mxu1 %v3030_v17 }
 0x5f3   :  { %2786 = vmatprep.subr.bf16.mxu1 %v3198_v1 }
 0x5f4   :  { %2817 = vmatpush3.bf16.xpose.msra.mxu0 %v3589_v60  ;;  %v3034_v60 = vld [vmem:[#allocation8 + $0x28] sm:$0xff]  }
 0x5f6   :  { %2787 = vmatpush3.bf16.msra.mxu1 %v3031_v32 }
 0x5f7   :  { %2788 = vmatprep.subr.bf16.mxu1 %v3198_v1 }
 0x5fa   :  { %2789 = vmatpush3.bf16.msra.mxu1 %v3032_v33 }
 0x5fb   :  { %2790 = vmatprep.subr.bf16.mxu1 %v3198_v1 }
 0x5fe   :  { %2791 = vmatpush3.bf16.msra.mxu1 %v3033_v59 }
 0x5ff   :  { %2792 = vmatprep.subr.bf16.mxu1 %v3198_v1 }
 0x602   :  { %2793 = vmatpush3.bf16.msra.mxu1 %v3034_v60 }
 0x603   :  { %2794 = vmatprep.subr.bf16.mxu1 %v3198_v1 }
 0x606   :  { %2795 = vmatpush3.bf16.msra.mxu1 %v3035_v34 }
 0x607   :  { %2796 = vmatprep.subr.bf16.mxu1 %v3198_v1 }
 0x60a   :  { %2797 = vmatpush3.bf16.msra.mxu1 %v3036_v35  ;;  %v2484_v35 = vld [vmem:[%s3354_s24] ss:$0 sm:$0xff] }
 0x680   :  { %v1494_v36 = vpop.f32.mrb[16].mxu1 }
 0x681   :  { %v2700_v37 = vpop.f32.mrb[17].mxu1  ;;  %v1495_v43 = vadd.f32 %v2445_v41, %v1494_v36 }
 0x682   :  { %v1497_v38 = vpop.f32.mrb[18].mxu1 }
 0x683   :  { %v2701_v39 = vpop.f32.mrb[19].mxu1 }
 0x68e   :  { %v1967_v8 = vpop.f32.mrb[16].mxu0 }
 0x68f   :  { %v2780_v13 = vpop.f32.mrb[17].mxu0  ;;  %v1968_v42 = vadd.f32 %v2475_v19, %v1967_v8 }
 0x690   :  { %v1970_v40 = vpop.f32.mrb[18].mxu0 }
 0x691   :  { %v2781_v14 = vpop.f32.mrb[19].mxu0  ;;  %v1971_v44 = vadd.f32 %v2475_v19, %v1970_v40  ;;  %v1976_v58 = vmul.f32 0.044715, %v1968_v42  ;;  %v1974_v53 = vmul.f32 0.5, %v1968_v42 }
 0x692   :  { %v2493_v14 = vld [vmem:[%s3359_s15] ss:$0 sm:$0xff] }
 0x693   :  { %v1977_v0 = vmul.f32 0.044715, %v1971_v44  ;;  %v1978_v2 = vmul.f32 %v1976_v58, %v1968_v42  ;;  %v1975_v55 = vmul.f32 0.5, %v1971_v44 }
 0x695   :  { %v1979_v24 = vmul.f32 %v1977_v0, %v1971_v44  ;;  %v1980_v3 = vmul.f32 %v1978_v2, %v1968_v42 }
 0x697   :  { %v1981_v4 = vmul.f32 %v1979_v24, %v1971_v44  ;;  %v1982_v5 = vadd.f32 %v1980_v3, %v1968_v42 }
 0x699   :  { %v1983_v6 = vadd.f32 %v1981_v4, %v1971_v44  ;;  %v1984_v7 = vmul.f32 0.7978846, %v1982_v5 }
 0x69b   :  { %v1985_v9 = vmul.f32 0.7978846, %v1983_v6  ;;  %3053 = vtanh.f32 %v1984_v7 }
 0x69d   :  { %3055 = vtanh.f32 %v1985_v9 }
 0x6a0   :  { %v1617_v45 = vpop.f32.mrb[20].mxu1 }
 0x6a1   :  { %v1624_v46 = vrot.slane %v1617_v45, 2  ;;  %v3701_v48 = vadd.f32 %v1617_v45, %v1495_v43  ;;  %v2720_v49 = vpop.f32.mrb[21].mxu1  ;;  %v2190_v45 = vld [vmem:[%s3785_s20 + $0x8] sm:$0xff] }
 0x6a2   :  { %v1620_v61 = vpop.f32.mrb[22].mxu1  ;;  %vm2230_vm2 = vcmp.ne.s32.totalorder %v2190_v45, 4294967196 }
 0x6a3   :  { %v3703_v62 = vadd.f32 %v1624_v46, %v1495_v43  ;;  %v2721_v63 = vpop.f32.mrb[23].mxu1  ;;  %v2189_v46 = vld [vmem:[%s3785_s20] sm:$0xff]  ;;  %v1635_v49 = vand.u32 2147483647, %v3701_v48 }
 0x6a4   :  { %vm2229_vm3 = vcmp.ne.s32.totalorder %v2189_v46, 4294967196 }
 0x6a5   :  { %v3054_v23 = vpop.eup %3053  ;;  %v1628_v58 = vand.u32 2147483647, %v3703_v62  ;;  %v1636_v61 = vsub.f32 0.0, %v1635_v49 }
 0x6a6   :  { %v1988_v52 = vadd.f32 1.0, %v3054_v23 }
 0x6a7   :  { %v3056_v27 = vpop.eup %3055  ;;  %v1629_v63 = vsub.f32 0.0, %v1628_v58  ;;  %v1637_v0 = vmul.f32 1.442695, %v1636_v61 }
 0x6a8   :  { %v1989_v21 = vadd.f32 1.0, %v3056_v27  ;;  %v1990_v56 = vmul.f32 %v1988_v52, %v1974_v53  ;;  %v1642_v52 = vmax.f32 %v3703_v62, 0.0 }
 0x6a9   :  { %v1630_v2 = vmul.f32 1.442695, %v1629_v63  ;;  %3057 = vpow2.f32 %v1637_v0 }
 0x6aa   :  { %v1991_v59 = vmul.f32 %v1989_v21, %v1975_v55  ;;  %v1643_v21 = vsub.f32 %v1642_v52, %v3703_v62 }
 0x6ab   :  { %3059 = vpow2.f32 %v1630_v2 }
 0x6b3   :  { %v3058_v24 = vpop.eup %3057 }
 0x6b4   :  { %v1639_v5 = vadd.f32 1.0, %v3058_v24 }
 0x6b5   :  { %v3060_v3 = vpop.eup %3059 }
 0x6b6   :  { %v1632_v9 = vadd.f32 1.0, %v3060_v3  ;;  %3061 = vlog2.f32 %v1639_v5 }
 0x6c0   :  { %v1855_v25 = vpop.f32.mrb[24].mxu1  ;;  %v3062_v23 = vpop.eup %3061 }
 0x6c1   :  { %v1856_v26 = vadd.f32 %v2466_v18, %v1855_v25  ;;  %v2760_v51 = vpop.f32.mrb[25].mxu1 }
 0x6c2   :  { %v1858_v29 = vpop.f32.mrb[26].mxu1 }
 0x6c3   :  { %v1999_v30 = vrot.slane %v1856_v26, %v1998_v22  ;;  %v2761_v50 = vpop.f32.mrb[27].mxu1  ;;  %v1641_v29 = vmul.f32 0.6931472, %v3062_v23 }
 0x6c5   :  { %v2000_v31 = vcombine.high %v1999_v30, %v1999_v30  ;;  %v2007_v54 = vrot.slane %v1999_v30, %v1998_v22  ;;  %v1659_v30 = vmax.f32 %v3701_v48, 0.0  ;;  %v2496_v48 = vsel %vm2229_vm3, 1.0, %v3198_v1 }
 0x6c7   :  { %v2014_v17 = vrot.slane %v2000_v31, %v1998_v22  ;;  %v2018_v32 = vrot.slane %v2007_v54, %v3542_v16  ;;  %v1660_v54 = vadd.f32 %v1659_v30, %v1641_v29 }
 0x6c9   :  { %v2022_v15 = vrot.slane %v2014_v17, %v3542_v16  ;;  %v2025_v33 = vadd.f32 %v2018_v32, %v1990_v56  ;;  %v2497_v56 = vsel %vm2230_vm2, 1.0, %v3198_v1  ;;  %v1661_v32 = vsel %vm1645_vm4, %v1660_v54, 0.0 }
 0x6cb   :  { %v2026_v60 = vadd.f32 %v2022_v15, %v1991_v59  ;;  %v2236_v15 = vsel %vm2235_vm5, %v2496_v48, 0.0 }
 0x6cd   :  { %v2043_v34 = vpack.c.bf16 %v2026_v60, %v2025_v33  ;;  %v2237_v33 = vsel %vm2235_vm5, %v2497_v56, 0.0 }
 0x6ce   :  { %v2238_v47 = vadd.f32 %v2237_v33, %v2236_v15 }
 0x6cf   :  { %2799 = vmatmul.mubr.bf16.vlgmr.msra.gmra.mrb[28].mxu1 %v2043_v34 }
 0x7a2   :  { %v2133_v36 = vpop.f32.mrb[28].mxu1 }
 0x7a3   :  { %v2800_v37 = vpop.f32.mrb[29].mxu1  ;;  %v2134_v39 = vadd.f32 %v2484_v35, %v2133_v36 }
 0x7a4   :  { %v2136_v38 = vpop.f32.mrb[30].mxu1 }
 0x7a5   :  { %v2137_v8 = vadd.f32 %v2484_v35, %v2136_v38  ;;  %v2801_v13 = vpop.f32.mrb[31].mxu1 }
 0x7a7   :  { %v2140_v40 = vpack.c.bf16 %v2137_v8, %v2134_v39 }
 0x7a9   :  { %2819 = vmatmul.mubr.bf16.vlgmr.msra.gmra.mrb[20].mxu0 %v2140_v40 }
 0x87c   :  { %v2182_v19 = vpop.f32.mrb[20].mxu0 }
 0x87d   :  { %v2183_v41 = vadd.f32 %v2493_v14, %v2182_v19  ;;  %v2820_v16 = vpop.f32.mrb[21].mxu0 }
 0x87e   :  { %v2185_v42 = vpop.f32.mrb[22].mxu0 }
 0x87f   :  { %v2186_v43 = vadd.f32 %v2493_v14, %v2185_v42  ;;  %2191 = vmax.xlane.f32.xlu0 %v2183_v41  ;;  %v2821_v44 = vpop.f32.mrb[23].mxu0 }
 0x881   :  { %2193 = vmax.xlane.f32.xlu1 %v2186_v43 }
 0x892   :  { %2215 = vperm.xlu1 %2878, %v2190_v45  }
 0x895   :  { %2212 = vperm.xlu0 %2877, %v2189_v46  }
 0x90c   :  { %v3715_v4 = vpop.xlane.xlu0 %2191 }
 0x90d   :  { %v2195_v6 = vsub.f32 %v2183_v41, %v3715_v4 }
 0x90e   :  { %v3718_v7 = vpop.xlane.xlu1 %2193 }
 0x90f   :  { %v2197_v10 = vmul.f32 1.442695, %v2195_v6  ;;  %v2196_v11 = vsub.f32 %v2186_v43, %v3718_v7 }
 0x911   :  { %3063 = vpow2.f32 %v2197_v10  ;;  %v2199_v12 = vmul.f32 1.442695, %v2196_v11 }
 0x912   :  { %3065 = vlog2.f32 %v1632_v9  ;;  %v2216_v22 = vpop.permute.xlu1 %2215 }
 0x913   :  { %3067 = vpow2.f32 %v2199_v12  ;;  %vm2218_vm0 = vcmp.eq.s32.totalorder %v3393_v20, %v2216_v22 }
 0x914   :  { %v2213_v18 = vpop.permute.xlu0 %2212  ;;  %v2495_v53 = vsel %vm2218_vm0, 1.0, %v3198_v1 }
 0x915   :  { %vm2217_vm15 = vcmp.eq.s32.totalorder %v3393_v20, %v2213_v18  ;;  %v1372_v20 = vsel %vm1371_vm1, %v1370_v57, 0.0  ;;  %v2224_v55 = vmul.f32 %v2495_v53, %v2186_v43 }
 0x916   :  { %v2494_v26 = vsel %vm2217_vm15, 1.0, %v3198_v1 }
 0x917   :  { %v2223_v50 = vmul.f32 %v2494_v26, %v2183_v41 }
 0x91b   :  { %v3064_v25 = vpop.eup %3063 }
 0x91c   :  { %v3066_v51 = vpop.eup %3065  ;;  %2201 = vadd.xlane.f32.xlu0 %v3064_v25 }
 0x91d   :  { %v3068_v27 = vpop.eup %3067  ;;  %v1634_v31 = vmul.f32 0.6931472, %v3066_v51 }
 0x91e   :  { %2203 = vadd.xlane.f32.xlu1 %v3068_v27 }
 0x91f   :  { %v1644_v17 = vadd.f32 %v1643_v21, %v1634_v31 }
 0x920   :  { %2225 = vadd.xlane.f32.xlu0 %v2223_v50 }
 0x921   :  { %v1646_v28 = vsel %vm1645_vm4, %v1644_v17, 0.0 }
 0x922   :  { %1373 = vadd.xlane.f32.xlu1 %v1372_v20 }
 0x924   :  { %2227 = vadd.xlane.f32.xlu0 %v2224_v55 }
 0x926   :  { %1662 = vadd.xlane.f32.xlu1 %v1661_v32 }
 0x928   :  { %1647 = vadd.xlane.f32.xlu0 %v1646_v28 }
 0x92c   :  { %2239 = vadd.xlane.f32.xlu0 %v2238_v47 }
 0x9a9   :  { %v2202_v57 = vpop.xlane.xlu0 %2201 }
 0x9aa   :  { %3069 = vlog2.f32 %v2202_v57 }
 0x9ab   :  { %v2204_v62 = vpop.xlane.xlu1 %2203 }
 0x9ac   :  { %3071 = vlog2.f32 %v2204_v62 }
 0x9ad   :  { %v2226_v59 = vpop.xlane.xlu0 %2225 }
 0x9af   :  { %v1374_v60 = vpop.xlane.xlu1 %1373 }
 0x9b0   :  { %v1375_v1 = vrot.slane %v1374_v60, 4 }
 0x9b1   :  { %v2228_v34 = vpop.xlane.xlu0 %2227 }
 0x9b2   :  { %v1376_v35 = vadd.f32 %v1375_v1, %v1374_v60 }
 0x9b3   :  { %v1663_v36 = vpop.xlane.xlu1 %1662 }
 0x9b4   :  { %v3070_v37 = vpop.eup %3069  ;;  %v1377_v38 = vrot.slane %v1376_v35, 2  ;;  %v1664_v39 = vrot.slane %v1663_v36, 4 }
 0x9b5   :  { %v2206_v8 = vmul.f32 0.6931472, %v3070_v37  ;;  %v1648_v13 = vpop.xlane.xlu0 %1647 }
 0x9b6   :  { %v3072_v40 = vpop.eup %3071  ;;  %v1665_v14 = vadd.f32 %v1664_v39, %v1663_v36  ;;  %v1649_v19 = vrot.slane %v1648_v13, 4  ;;  %v1378_v41 = vadd.f32 %v1377_v38, %v1376_v35 }
 0x9b7   :  { %v2208_v16 = vmul.f32 0.6931472, %v3072_v40  ;;  %v2209_v42 = vadd.f32 %v2206_v8, %v3715_v4 }
 0x9b8   :  { %v1666_v43 = vrot.slane %v1665_v14, 2  ;;  %v1650_v44 = vadd.f32 %v1649_v19, %v1648_v13  ;;  %v1379_v45 = vrot.slane %v1378_v41, 1 }
 0x9b9   :  { %v2249_v46 = vsub.f32 %v2209_v42, %v2226_v59  ;;  %v2210_v49 = vadd.f32 %v2208_v16, %v3718_v7  ;;  %v2240_v58 = vpop.xlane.xlu0 %2239 }
 0x9ba   :  { %v1651_v61 = vrot.slane %v1650_v44, 2  ;;  %v1380_v63 = vadd.f32 %v1379_v45, %v1378_v41  ;;  %v1667_v0 = vadd.f32 %v1666_v43, %v1665_v14  ;;  %v2241_v2 = vrot.slane %v2240_v58, 4 }
 0x9bb   :  { %v2251_v24 = vmul.f32 %v2496_v48, %v2249_v46  ;;  %v2250_v3 = vsub.f32 %v2210_v49, %v2228_v34 }
 0x9bc   :  { %2822 = vpush %v1380_v63  ;;  %v1652_v5 = vadd.f32 %v1651_v61, %v1650_v44  ;;  %v2242_v6 = vadd.f32 %v2241_v2, %v2240_v58  ;;  %v1668_v10 = vrot.slane %v1667_v0, 1 }
 0x9bd   :  { %v2252_v9 = vmul.f32 %v2497_v56, %v2250_v3  ;;  %v2253_v12 = vsel %vm2235_vm5, %v2251_v24, 0.0 }
 0x9be   :  { %v1653_v11 = vrot.slane %v1652_v5, 1  ;;  %v2243_v4 = vrot.slane %v2242_v6, 2  ;;  %v1669_v25 = vadd.f32 %v1668_v10, %v1667_v0 }
 0x9bf   :  { %v2254_v18 = vsel %vm2235_vm5, %v2252_v9, 0.0 }
 0x9c0   :  { %v2255_v22 = vadd.f32 %v2254_v18, %v2253_v12  ;;  %v1654_v7 = vadd.f32 %v1653_v11, %v1652_v5  ;;  %v2244_v23 = vadd.f32 %v2243_v4, %v2242_v6 }
 0x9c2   :  { %2256 = vadd.xlane.f32.xlu1 %v2255_v22  ;;  %2824 = vpush %v1654_v7  ;;  %v2245_v26 = vrot.slane %v2244_v23, 1 }
 0x9c3   :  { %2826 = vpush %v1669_v25 }
 0x9c4   :  { %v2246_v51 = vadd.f32 %v2245_v26, %v2244_v23 }
 0x9c6   :  { %2828 = vpush %v2246_v51 }
 0x9ed   :  { %s3739_s24 = spop %2822 }
 0x9ee   :  { %s1384_s27 = smul.f32 0.5, %s3739_s24 }
 0x9f0   :  { %2283 = sst [smem:[#allocation10 + $0x2]] %s1384_s27  ;;  %s2270_s10 = smul.f32 %s2269_s1, %s1384_s27 }
 0x9f3   :  { %s3742_s15 = spop %2824 }
 0x9f4   :  { %s1658_s18 = smul.f32 0.5, %s3742_s15  ;;  %s3745_s22 = spop %2826 }
 0x9f5   :  { %s1673_s17 = smul.f32 0.5, %s3745_s22 }
 0x9f6   :  { %2285 = sst [smem:[#allocation10 + $0x3]] %s1658_s18  ;;  %s2273_s16 = smul.f32 %s2498_s25, %s1658_s18 }
 0x9f7   :  { %2287 = sst [smem:[#allocation10 + $0x4]] %s1673_s17  ;;  %s2829_s26 = spop %2828 }
 0x9f8   :  { %s2248_s4 = smax.f32 %s3201_s0, %s2829_s26  ;;  %s2276_s13 = smul.f32 %s2499_s28, %s1673_s17 }
 0x9f9   :  { %v2265_v27 = vstv %s2248_s4 }
 0x9fa   :  { %3073 = vrcp.f32 %v2265_v27 }
 0xa04   :  { %v3074_v54 = vpop.eup %3073 }
 0xa4f   :  { %v2257_v29 = vpop.xlane.xlu1 %2256 }
 0xa50   :  { %v2258_v52 = vrot.slane %v2257_v29, 4 }
 0xa52   :  { %v2259_v30 = vadd.f32 %v2258_v52, %v2257_v29 }
 0xa54   :  { %v2260_v50 = vrot.slane %v2259_v30, 2 }
 0xa56   :  { %v2261_v53 = vadd.f32 %v2260_v50, %v2259_v30 }
 0xa58   :  { %v2262_v31 = vrot.slane %v2261_v53, 1 }
 0xa5a   :  { %v2263_v20 = vadd.f32 %v2262_v31, %v2261_v53 }
 0xa5c   :  { %2830 = vpush %v2263_v20 }
 0xa5d   :  { %2832 = vpush %v3074_v54 }
 0xa8d   :  { %s2831_s2 = spop %2830 }
 0xa8e   :  { %s2833_s7 = spop %2832 }
 0xa8f   :  { %s2268_s11 = smul.f32 %s2833_s7, %s2831_s2 }
 0xa91   :  { %s2271_s5 = sadd.f32 %s2270_s10, %s2268_s11 }
 0xa92   :  { %2281 = sst [smem:[#allocation10 + $0x1]] %s2268_s11 }
 0xa93   :  { %s2274_s21 = sadd.f32 %s2273_s16, %s2271_s5 }
 0xa95   :  { %s2277_s8 = sadd.f32 %s2276_s13, %s2274_s21 }
 0xa97   :  { %2279 = sst [smem:[#allocation10]] %s2277_s8 }
 0xa98   :  { %3151 = shalt.err (!%p3148_p11)
}
 0xa99   :  { %s3202_s29 = smov [#allocation10]  }
 0xa9a   :  { %2297 = dma.smem_to_vmem %s3202_s29, 16, %s2295_s9, [#allocation6]  }
 0xa9b   :  { %3158 = dma.done.wait [#allocation6], 16  }
 0xa9c   :  { %3159 = vsyncadd [#allocation6], 4294967280 }
 0xa9d   :  { %2301 = sfence }
 0xa9e   :  { %2302 = vsyncpa [#allocation4], 1 }
 0xa9f   :  { %2303 = vsyncpa [#allocation9], 1 }
 0xaa0   :  { %2304 = vsyncpa [#allocation5], 1 }
 0xaa1   :  { %2305 = vsyncpa [#allocation6], 1 }

</bundles_post_ra>
